<compile_context>
chip_gen: v6e
topology: v6e:2x2x1
jax: 0.10.0
libtpu: 0.0.40
codegen_flags: <defaults>
</compile_context>

<pallas_src>
import functools

import jax
import jax.numpy as jnp
from jax import lax
from jax.experimental import pallas as pl
from jax.experimental.pallas import tpu as pltpu


def actor_kernel(x_ref, w1_ref, b1_ref, w2_ref, b2_ref, w3_ref, b3_ref,
                 logits_ref, logp_ref):
    # x: (tile, D) natural row-major layout.  Contract over D (lhs dim 1 with
    # rhs dim 1) -> (H1, tile): batch stays on the lane axis, no wrapper
    # transpose needed.  Matmul operands are bf16, accumulation is f32.
    x = x_ref[...].astype(w1_ref.dtype)
    h1 = jnp.tanh(
        lax.dot_general(w1_ref[...], x, (((1,), (1,)), ((), ())),
                        preferred_element_type=jnp.float32)
        + b1_ref[...])
    # Layer 2 (dominant FLOPs): (H2, H1) x (H1, tile) -> (H2, tile).
    h2 = jnp.tanh(
        jnp.dot(w2_ref[...], h1.astype(w2_ref.dtype),
                preferred_element_type=jnp.float32)
        + b2_ref[...])
    # Layer 3: (A, H2) x (H2, tile) -> (A, tile); lane-dense store.
    logits = (jnp.dot(w3_ref[...], h2.astype(w3_ref.dtype),
                      preferred_element_type=jnp.float32)
              + b3_ref[...])
    logits_ref[...] = logits

    # Fused Categorical epilogue: stable log-softmax over the action axis
    # (A = 8 sublanes -> cheap XLU reduction, exp/log ride the EUP slot).
    m = jnp.max(logits, axis=0, keepdims=True)
    z = logits - m
    lse = jnp.log(jnp.sum(jnp.exp(z), axis=0, keepdims=True))
    logp_ref[...] = z - lse


def _round_up(n, m):
    return ((n + m - 1) // m) * m


@functools.partial(jax.jit, static_argnames=("batch_tile", "matmul_dtype"))
def actor_forward(x, w1, b1, w2, b2, w3, b3, batch_tile=2048,
                  matmul_dtype=jnp.bfloat16):
    """Fused Actor MLP forward.

    Returns (logits, log_probs), both feature-major with shape
    (n_actions, B).  torch.distributions.Categorical(logits=...) is fully
    parameterized by these logits; log_probs is its log-softmax, computed in
    the kernel epilogue.
    """
    B, D = x.shape
    H1 = w1.shape[0]
    H2 = w2.shape[0]
    A = w3.shape[0]

    # Single large 128-aligned batch tile; no forced multi-step split (pure
    # overhead + extra padding on 1-TC chips).  Large batches still produce
    # multiple "parallel" steps that v7x's two TensorCores can shard.
    aligned_b = _round_up(B, 128)
    tile = min(_round_up(batch_tile, 128), aligned_b)
    Bp = _round_up(B, tile)
    grid = (Bp // tile,)

    if Bp != B:
        x = jnp.pad(x, ((0, Bp - B), (0, 0)))

    # Pre-cast matmul weights once (biases stay f32; they are added to the
    # f32 accumulator).
    w1c = w1.astype(matmul_dtype)
    w2c = w2.astype(matmul_dtype)
    w3c = w3.astype(matmul_dtype)

    full = lambda shape: pl.BlockSpec(shape, lambda i: (0, 0))
    in_specs = [
        pl.BlockSpec((tile, D), lambda i: (i, 0)),   # x, batch-tiled, row-major
        full((H1, D)), full((H1, 1)),                # W1, b1
        full((H2, H1)), full((H2, 1)),               # W2, b2
        full((A, H2)), full((A, 1)),                 # W3, b3
    ]
    out_specs = [
        pl.BlockSpec((A, tile), lambda i: (0, i)),   # logits (feature-major)
        pl.BlockSpec((A, tile), lambda i: (0, i)),   # log-probs (feature-major)
    ]

    logits_fm, logp_fm = pl.pallas_call(
        actor_kernel,
        out_shape=(jax.ShapeDtypeStruct((A, Bp), jnp.float32),
                   jax.ShapeDtypeStruct((A, Bp), jnp.float32)),
        grid_spec=pltpu.PrefetchScalarGridSpec(
            num_scalar_prefetch=0,
            grid=grid,
            in_specs=in_specs,
            out_specs=out_specs,
        ),
        compiler_params=pltpu.CompilerParams(
            dimension_semantics=("parallel",)),
    )(x, w1c, b1, w2c, b2, w3c, b3)

    # Drop batch padding; keep feature-major (A, B) layout for the consumer.
    return logits_fm[:, :B], logp_fm[:, :B]


def init_linear_params(key, fan_in, fan_out):
    # Matches torch.nn.Linear default init: U(-1/sqrt(fan_in), 1/sqrt(fan_in)).
    kw, kb = jax.random.split(key)
    bound = 1.0 / jnp.sqrt(jnp.float32(fan_in))
    w = jax.random.uniform(kw, (fan_out, fan_in), jnp.float32, -bound, bound)
    b = jax.random.uniform(kb, (fan_out, 1), jnp.float32, -bound, bound)
    return w, b


def reference_forward(x, w1, b1, w2, b2, w3, b3):
    h1 = jnp.tanh(x @ w1.T + b1[:, 0])
    h2 = jnp.tanh(h1 @ w2.T + b2[:, 0])
    return h2 @ w3.T + b3[:, 0]


# TODO(synk): Adam/amsgrad optimizer and checkpoint save/load have no Pallas
# equivalent; only the forward pass (Categorical logits + log-probs) is
# implemented here.

if __name__ == "__main__":
    key = jax.random.PRNGKey(0)
    k_x, k1, k2, k3 = jax.random.split(key, 4)

    # Module defaults h1_size = h2_size = 256; small input/action dims.
    # Batch of 300 exercises ceil-div padding (pads to 384, single grid step).
    batch, in_dim, h1_size, h2_size, n_actions = 300, 16, 256, 256, 8

    x = jax.random.normal(k_x, (batch, in_dim), jnp.float32)
    w1, b1 = init_linear_params(k1, in_dim, h1_size)
    w2, b2 = init_linear_params(k2, h1_size, h2_size)
    w3, b3 = init_linear_params(k3, h2_size, n_actions)

    logits_fm, logp_fm = actor_forward(x, w1, b1, w2, b2, w3, b3)
    jax.block_until_ready((logits_fm, logp_fm))

    assert logits_fm.shape == (n_actions, batch)
    assert logp_fm.shape == (n_actions, batch)

    # Reference (f32 end-to-end); kernel uses bf16 matmul operands with f32
    # accumulation, so tolerances are relaxed accordingly.
    ref_logits = reference_forward(x, w1, b1, w2, b2, w3, b3)      # (B, A)
    ref_logp = jax.nn.log_softmax(ref_logits, axis=-1)

    logits = logits_fm.T                                           # (B, A)
    logp = logp_fm.T

    assert jnp.allclose(logits, ref_logits, atol=3e-2, rtol=3e-2), (
        float(jnp.max(jnp.abs(logits - ref_logits))))
    assert jnp.allclose(logp, ref_logp, atol=3e-2, rtol=3e-2), (
        float(jnp.max(jnp.abs(logp - ref_logp))))

    # Categorical consistency: probs from the fused log-softmax sum to 1 and
    # match the reference softmax.
    probs = jnp.exp(logp)
    ref_probs = jax.nn.softmax(ref_logits, axis=-1)
    assert jnp.allclose(jnp.sum(probs, axis=-1), 1.0, atol=1e-5)
    assert jnp.allclose(probs, ref_probs, atol=1e-2), (
        float(jnp.max(jnp.abs(probs - ref_probs))))

    print("KERNEL_OK")
</pallas_src>

<mosaic_0001>
module attributes {stable_mosaic.version = 11 : i64} {
  func.func @actor_kernel(%arg0: i32, %arg1: memref<384x16xf32, #tpu.memory_space<vmem>>, %arg2: memref<256x16xbf16, #tpu.memory_space<vmem>>, %arg3: memref<256x1xf32, #tpu.memory_space<vmem>>, %arg4: memref<256x256xbf16, #tpu.memory_space<vmem>>, %arg5: memref<256x1xf32, #tpu.memory_space<vmem>>, %arg6: memref<8x256xbf16, #tpu.memory_space<vmem>>, %arg7: memref<8x1xf32, #tpu.memory_space<vmem>>, %arg8: memref<8x384xf32, #tpu.memory_space<vmem>>, %arg9: memref<8x384xf32, #tpu.memory_space<vmem>>) attributes {dimension_semantics = [#tpu.dimension_semantics<parallel>], iteration_bounds = array<i64: 1>, scalar_prefetch = 0 : i64, scratch_operands = 0 : i64, tpu.core_type = #tpu.core_type<tc>, window_params = [{transform_indices = @transform_0, window_bounds = array<i64: 384, 16>}, {pipeline_mode = #tpu.pipeline_mode<synchronous>, transform_indices = @transform_1, window_bounds = array<i64: 256, 16>}, {pipeline_mode = #tpu.pipeline_mode<synchronous>, transform_indices = @transform_2, window_bounds = array<i64: 256, 1>}, {pipeline_mode = #tpu.pipeline_mode<synchronous>, transform_indices = @transform_3, window_bounds = array<i64: 256, 256>}, {pipeline_mode = #tpu.pipeline_mode<synchronous>, transform_indices = @transform_4, window_bounds = array<i64: 256, 1>}, {pipeline_mode = #tpu.pipeline_mode<synchronous>, transform_indices = @transform_5, window_bounds = array<i64: 8, 256>}, {pipeline_mode = #tpu.pipeline_mode<synchronous>, transform_indices = @transform_6, window_bounds = array<i64: 8, 1>}, {transform_indices = @transform_7, window_bounds = array<i64: 8, 384>}, {transform_indices = @transform_8, window_bounds = array<i64: 8, 384>}]} {
    %c0 = arith.constant 0 : index
    %c0_0 = arith.constant 0 : index
    %0 = vector.load %arg1[%c0, %c0_0] : memref<384x16xf32, #tpu.memory_space<vmem>>, vector<384x16xf32>
    %1 = arith.truncf %0 : vector<384x16xf32> to vector<384x16xbf16>
    %c0_1 = arith.constant 0 : index
    %c0_2 = arith.constant 0 : index
    %2 = vector.load %arg2[%c0_1, %c0_2] : memref<256x16xbf16, #tpu.memory_space<vmem>>, vector<256x16xbf16>
    %cst = arith.constant dense<0.000000e+00> : vector<256x384xf32>
    %3 = tpu.matmul %2, %1, %cst {dimension_numbers = #tpu.dot_dimension_numbers<[1], [1], [0], [0], [0, 0, 1, 0], [], []>} : vector<256x16xbf16>, vector<384x16xbf16>, vector<256x384xf32> -> vector<256x384xf32>
    %c0_3 = arith.constant 0 : index
    %c0_4 = arith.constant 0 : index
    %4 = vector.load %arg3[%c0_3, %c0_4] : memref<256x1xf32, #tpu.memory_space<vmem>>, vector<256x1xf32>
    %5 = vector.broadcast %4 : vector<256x1xf32> to vector<256x384xf32>
    %6 = arith.addf %3, %5 : vector<256x384xf32>
    %7 = math.tanh %6 : vector<256x384xf32>
    %c0_5 = arith.constant 0 : index
    %c0_6 = arith.constant 0 : index
    %8 = vector.load %arg4[%c0_5, %c0_6] : memref<256x256xbf16, #tpu.memory_space<vmem>>, vector<256x256xbf16>
    %9 = arith.truncf %7 : vector<256x384xf32> to vector<256x384xbf16>
    %cst_7 = arith.constant dense<0.000000e+00> : vector<256x384xf32>
    %10 = tpu.matmul %8, %9, %cst_7 {dimension_numbers = #tpu.dot_dimension_numbers<[1], [0], [0], [1], [0, 0, 1, 1], [], []>} : vector<256x256xbf16>, vector<256x384xbf16>, vector<256x384xf32> -> vector<256x384xf32>
    %c0_8 = arith.constant 0 : index
    %c0_9 = arith.constant 0 : index
    %11 = vector.load %arg5[%c0_8, %c0_9] : memref<256x1xf32, #tpu.memory_space<vmem>>, vector<256x1xf32>
    %12 = vector.broadcast %11 : vector<256x1xf32> to vector<256x384xf32>
    %13 = arith.addf %10, %12 : vector<256x384xf32>
    %14 = math.tanh %13 : vector<256x384xf32>
    %c0_10 = arith.constant 0 : index
    %c0_11 = arith.constant 0 : index
    %15 = vector.load %arg6[%c0_10, %c0_11] : memref<8x256xbf16, #tpu.memory_space<vmem>>, vector<8x256xbf16>
    %16 = arith.truncf %14 : vector<256x384xf32> to vector<256x384xbf16>
    %cst_12 = arith.constant dense<0.000000e+00> : vector<8x384xf32>
    %17 = tpu.matmul %15, %16, %cst_12 {dimension_numbers = #tpu.dot_dimension_numbers<[1], [0], [0], [1], [0, 0, 1, 1], [], []>} : vector<8x256xbf16>, vector<256x384xbf16>, vector<8x384xf32> -> vector<8x384xf32>
    %c0_13 = arith.constant 0 : index
    %c0_14 = arith.constant 0 : index
    %18 = vector.load %arg7[%c0_13, %c0_14] : memref<8x1xf32, #tpu.memory_space<vmem>>, vector<8x1xf32>
    %19 = vector.broadcast %18 : vector<8x1xf32> to vector<8x384xf32>
    %20 = arith.addf %17, %19 : vector<8x384xf32>
    %c0_15 = arith.constant 0 : index
    %c0_16 = arith.constant 0 : index
    %21 = vector.load %arg8[%c0_15, %c0_16] : memref<8x384xf32, #tpu.memory_space<vmem>>, vector<8x384xf32>
    tpu.vector_store %arg8[%c0_15, %c0_16], %20 {strides = array<i32>} : memref<8x384xf32, #tpu.memory_space<vmem>>, vector<8x384xf32>,
    %cst_17 = arith.constant dense<0xFF800000> : vector<384xf32>
    %22 = vector.multi_reduction <maximumf>, %20, %cst_17 [0] : vector<8x384xf32> to vector<384xf32>
    %23 = vector.shape_cast %22 : vector<384xf32> to vector<1x384xf32>
    %24 = vector.broadcast %23 : vector<1x384xf32> to vector<8x384xf32>
    %25 = arith.subf %20, %24 : vector<8x384xf32>
    %26 = math.exp %25 : vector<8x384xf32>
    %cst_18 = arith.constant dense<0.000000e+00> : vector<384xf32>
    %27 = vector.multi_reduction <add>, %26, %cst_18 [0] : vector<8x384xf32> to vector<384xf32>
    %28 = vector.shape_cast %27 : vector<384xf32> to vector<1x384xf32>
    %29 = math.log %28 : vector<1x384xf32>
    %30 = vector.broadcast %29 : vector<1x384xf32> to vector<8x384xf32>
    %31 = arith.subf %25, %30 : vector<8x384xf32>
    %c0_19 = arith.constant 0 : index
    %c0_20 = arith.constant 0 : index
    %32 = vector.load %arg9[%c0_19, %c0_20] : memref<8x384xf32, #tpu.memory_space<vmem>>, vector<8x384xf32>
    tpu.vector_store %arg9[%c0_19, %c0_20], %31 {strides = array<i32>} : memref<8x384xf32, #tpu.memory_space<vmem>>, vector<8x384xf32>,
    return
  }
  func.func @transform_0(%arg0: i32) -> (i32, i32) {
    %c0_i32 = arith.constant 0 : i32
    %c0_i32_0 = arith.constant 0 : i32
    return %arg0, %c0_i32 : i32, i32
  }
  func.func @transform_1(%arg0: i32) -> (i32, i32) {
    %c0_i32 = arith.constant 0 : i32
    %c0_i32_0 = arith.constant 0 : i32
    %c0_i32_1 = arith.constant 0 : i32
    return %c0_i32, %c0_i32_0 : i32, i32
  }
  func.func @transform_2(%arg0: i32) -> (i32, i32) {
    %c0_i32 = arith.constant 0 : i32
    %c0_i32_0 = arith.constant 0 : i32
    %c0_i32_1 = arith.constant 0 : i32
    return %c0_i32, %c0_i32_0 : i32, i32
  }
  func.func @transform_3(%arg0: i32) -> (i32, i32) {
    %c0_i32 = arith.constant 0 : i32
    %c0_i32_0 = arith.constant 0 : i32
    %c0_i32_1 = arith.constant 0 : i32
    return %c0_i32, %c0_i32_0 : i32, i32
  }
  func.func @transform_4(%arg0: i32) -> (i32, i32) {
    %c0_i32 = arith.constant 0 : i32
    %c0_i32_0 = arith.constant 0 : i32
    %c0_i32_1 = arith.constant 0 : i32
    return %c0_i32, %c0_i32_0 : i32, i32
  }
  func.func @transform_5(%arg0: i32) -> (i32, i32) {
    %c0_i32 = arith.constant 0 : i32
    %c0_i32_0 = arith.constant 0 : i32
    %c0_i32_1 = arith.constant 0 : i32
    return %c0_i32, %c0_i32_0 : i32, i32
  }
  func.func @transform_6(%arg0: i32) -> (i32, i32) {
    %c0_i32 = arith.constant 0 : i32
    %c0_i32_0 = arith.constant 0 : i32
    %c0_i32_1 = arith.constant 0 : i32
    return %c0_i32, %c0_i32_0 : i32, i32
  }
  func.func @transform_7(%arg0: i32) -> (i32, i32) {
    %c0_i32 = arith.constant 0 : i32
    %c0_i32_0 = arith.constant 0 : i32
    return %c0_i32, %arg0 : i32, i32
  }
  func.func @transform_8(%arg0: i32) -> (i32, i32) {
    %c0_i32 = arith.constant 0 : i32
    %c0_i32_0 = arith.constant 0 : i32
    return %c0_i32, %arg0 : i32, i32
  }
}

</mosaic_0001>

<bundles_post_ra>
// kernel: actor_forward.1
= control target key start
LH: loop header
LB: loop body
LE: loop exit
PB: predicated region body
PF: predicated region fallthrough
CT: control target
= control target key end

     0   :  { %14 = vsyncpa [#allocation3], 0  ;;  %vm407_vm0 = vcmask 130048   ;;  %v2954_v7 = vmov 0   ;;  %s4513_s0 = inlined_call_operand.vmem [shape: f32[384,16], index: 0, kind: input, shape index: {}]   ;;  %s4514_s1 = inlined_call_operand.vmem [shape: bf16[256,16], index: 1, kind: input, shape index: {}]   ;;  %s4515_s2 = inlined_call_operand.vmem [shape: f32[256,1], index: 2, kind: input, shape index: {}]   ;;  %s4516_s3 = inlined_call_operand.vmem [shape: bf16[256,256], index: 3, kind: input, shape index: {}]   ;;  %s4517_s4 = inlined_call_operand.vmem [shape: f32[256,1], index: 4, kind: input, shape index: {}]   ;;  %s4518_s5 = inlined_call_operand.vmem [shape: bf16[8,256], index: 5, kind: input, shape index: {}]   ;;  %s4519_s6 = inlined_call_operand.vmem [shape: f32[8,1], index: 6, kind: input, shape index: {}]   ;;  %s4520_s7 = inlined_call_operand.hbm [shape: f32[8,384], index: 7, kind: output, shape index: {0}]   ;;  %s4521_s8 = inlined_call_operand.hbm [shape: f32[8,384], index: 8, kind: output, shape index: {1}]  }
   0x1   :  { %v61_v0 = vld [vmem:[%s4513_s0 + $0xf0] sm:$0xff]  ;;  %v62_v1 = vld [vmem:[%s4513_s0 + $0xf8] sm:$0xff]  ;;  %2446 = vset.pattern.permute.xlu0 %v2954_v7  ;;  %2447 = vset.pattern.permute.xlu1 %v2954_v7  ;;  %v59_v10 = vld [vmem:[%s4513_s0 + $0xe0] sm:$0xff] }
   0x2   :  { %v77_v2 = vld [vmem:[%s4513_s0 + $0x170] sm:$0xff]  ;;  %v94_v3 = vpack.c.bf16 %v62_v1, %v61_v0  ;;  %v78_v4 = vld [vmem:[%s4513_s0 + $0x178] sm:$0xff]  ;;  %v60_v11 = vld [vmem:[%s4513_s0 + $0xe8] sm:$0xff] }
   0x3   :  { %v45_v5 = vld [vmem:[%s4513_s0 + $0x70] sm:$0xff]  ;;  %v46_v6 = vld [vmem:[%s4513_s0 + $0x78] sm:$0xff]  ;;  %v102_v8 = vpack.c.bf16 %v78_v4, %v77_v2  ;;  %v75_v12 = vld [vmem:[%s4513_s0 + $0x160] sm:$0xff]  ;;  %v93_v13 = vpack.c.bf16 %v60_v11, %v59_v10 }
   0x4   :  { %v86_v9 = vpack.c.bf16 %v46_v6, %v45_v5  ;;  %2427 = vmatprep.subr.msk.bf16.mxu0 %vm407_vm0, %v94_v3  ;;  %v76_v14 = vld [vmem:[%s4513_s0 + $0x168] sm:$0xff]  ;;  %v43_v15 = vld [vmem:[%s4513_s0 + $0x60] sm:$0xff]  ;;  %v57_v21 = vld [vmem:[%s4513_s0 + $0xd0] sm:$0xff] }
   0x5   :  { %v44_v16 = vld [vmem:[%s4513_s0 + $0x68] sm:$0xff]  ;;  %2435 = vmatprep.subr.msk.bf16.mxu1 %vm407_vm0, %v102_v8  ;;  %v526_v18 = vsel %vm407_vm0, %v102_v8, 0  ;;  %v101_v19 = vpack.c.bf16 %v76_v14, %v75_v12  ;;  %v58_v22 = vld [vmem:[%s4513_s0 + $0xd8] sm:$0xff]  ;;  %v73_v23 = vld [vmem:[%s4513_s0 + $0x150] sm:$0xff] }
   0x6   :  { %v478_v17 = vsel %vm407_vm0, %v86_v9, 0  ;;  %2380 = vmatpush3.bf16.xpose.msra.mxu1 %v526_v18  ;;  %v85_v20 = vpack.c.bf16 %v44_v16, %v43_v15  ;;  %v74_v24 = vld [vmem:[%s4513_s0 + $0x158] sm:$0xff]  ;;  %v92_v27 = vpack.c.bf16 %v58_v22, %v57_v21  ;;  %v41_v29 = vld [vmem:[%s4513_s0 + $0x50] sm:$0xff]  ;;  %v55_v32 = vld [vmem:[%s4513_s0 + $0xc0] sm:$0xff] }
   0x7   :  { %2174 = vmatpush3.bf16.xpose.msra.mxu0 %v478_v17  ;;  %2436 = vmatprep.subr.msk.bf16.mxu1 %vm407_vm0, %v101_v19  ;;  %v523_v26 = vsel %vm407_vm0, %v101_v19, 0  ;;  %v100_v28 = vpack.c.bf16 %v74_v24, %v73_v23  ;;  %v42_v30 = vld [vmem:[%s4513_s0 + $0x58] sm:$0xff]  ;;  %v56_v33 = vld [vmem:[%s4513_s0 + $0xc8] sm:$0xff]  ;;  %v71_v34 = vld [vmem:[%s4513_s0 + $0x140] sm:$0xff] }
   0x8   :  { %2428 = vmatprep.subr.msk.bf16.mxu0 %vm407_vm0, %v93_v13  ;;  %v475_v25 = vsel %vm407_vm0, %v85_v20, 0  ;;  %v84_v31 = vpack.c.bf16 %v42_v30, %v41_v29  ;;  %v72_v35 = vld [vmem:[%s4513_s0 + $0x148] sm:$0xff]  ;;  %v3081_v36 = vld [vmem:[%s4514_s1] sm:$0xff]   ;;  %v149_v37 = vld [vmem:[%s4515_s2 + $0x70] sm:$0xff]  ;;  %v91_v40 = vpack.c.bf16 %v56_v33, %v55_v32 }
   0x9   :  { %v520_v39 = vsel %vm407_vm0, %v100_v28, 0  ;;  %v99_v41 = vpack.c.bf16 %v72_v35, %v71_v34  ;;  %v39_v42 = vld [vmem:[%s4513_s0 + $0x40] sm:$0xff]  ;;  %v40_v43 = vld [vmem:[%s4513_s0 + $0x48] sm:$0xff]  ;;  %239 = vperm.xlu0 %2446, %v149_v37   ;;  %2189 = vmatprep.mubr.msk.bf16.mxu0 %vm407_vm0, %v3081_v36  ;;  %v150_v45 = vld [vmem:[%s4515_s2 + $0x78] sm:$0xff] }
   0xa   :  { %v472_v38 = vsel %vm407_vm0, %v84_v31, 0  ;;  %2395 = vmatprep.mubr.msk.bf16.mxu1 %vm407_vm0, %v3081_v36  ;;  %v147_v44 = vld [vmem:[%s4515_s2 + $0x60] sm:$0xff]  ;;  %v148_v46 = vld [vmem:[%s4515_s2 + $0x68] sm:$0xff]  ;;  %v83_v47 = vpack.c.bf16 %v40_v43, %v39_v42  ;;  %v53_v48 = vld [vmem:[%s4513_s0 + $0xb0] sm:$0xff] }
   0xb   :  { %229 = vperm.xlu1 %2447, %v147_v44   ;;  %v54_v49 = vld [vmem:[%s4513_s0 + $0xb8] sm:$0xff]  ;;  %v69_v50 = vld [vmem:[%s4513_s0 + $0x130] sm:$0xff]  ;;  %v517_v55 = vsel %vm407_vm0, %v99_v41, 0  ;;  %v143_v60 = vld [vmem:[%s4515_s2 + $0x40] sm:$0xff] }
   0xc   :  { %v70_v51 = vld [vmem:[%s4513_s0 + $0x138] sm:$0xff]  ;;  %v145_v52 = vld [vmem:[%s4515_s2 + $0x50] sm:$0xff]  ;;  %v469_v54 = vsel %vm407_vm0, %v83_v47, 0  ;;  %v90_v56 = vpack.c.bf16 %v54_v49, %v53_v48  ;;  %v144_v61 = vld [vmem:[%s4515_s2 + $0x48] sm:$0xff] }
   0xd   :  { %244 = vperm.xlu0 %2446, %v150_v45   ;;  %v146_v53 = vld [vmem:[%s4515_s2 + $0x58] sm:$0xff]  ;;  %v98_v57 = vpack.c.bf16 %v70_v51, %v69_v50  ;;  %v37_v58 = vld [vmem:[%s4513_s0 + $0x30] sm:$0xff]  ;;  %v51_v63 = vld [vmem:[%s4513_s0 + $0xa0] sm:$0xff] }
   0xe   :  { %2382 = vmatpush3.bf16.xpose.msra.mxu1 %v523_v26  ;;  %v38_v59 = vld [vmem:[%s4513_s0 + $0x38] sm:$0xff]  ;;  %v52_v0 = vld [vmem:[%s4513_s0 + $0xa8] sm:$0xff]  ;;  %v67_v1 = vld [vmem:[%s4513_s0 + $0x120] sm:$0xff] }
   0xf   :  { %2176 = vmatpush3.bf16.xpose.msra.mxu0 %v475_v25  ;;  %2437 = vmatprep.subr.msk.bf16.mxu1 %vm407_vm0, %v100_v28  ;;  %v82_v62 = vpack.c.bf16 %v38_v59, %v37_v58  ;;  %v68_v2 = vld [vmem:[%s4513_s0 + $0x128] sm:$0xff]  ;;  %v141_v3 = vld [vmem:[%s4515_s2 + $0x30] sm:$0xff]  ;;  %v142_v4 = vld [vmem:[%s4515_s2 + $0x38] sm:$0xff]  ;;  %v514_v6 = vsel %vm407_vm0, %v98_v57, 0  ;;  %v89_v7 = vpack.c.bf16 %v52_v0, %v51_v63 }
  0x10   :  { %2429 = vmatprep.subr.msk.bf16.mxu0 %vm407_vm0, %v92_v27  ;;  %234 = vperm.xlu1 %2447, %v148_v46   ;;  %v97_v8 = vpack.c.bf16 %v68_v2, %v67_v1  ;;  %v35_v9 = vld [vmem:[%s4513_s0 + $0x20] sm:$0xff]  ;;  %v36_v10 = vld [vmem:[%s4513_s0 + $0x28] sm:$0xff]  ;;  %v49_v12 = vld [vmem:[%s4513_s0 + $0x90] sm:$0xff] }
  0x11   :  { %219 = vperm.xlu0 %2446, %v145_v52   ;;  %v466_v5 = vsel %vm407_vm0, %v82_v62, 0  ;;  %v139_v11 = vld [vmem:[%s4515_s2 + $0x20] sm:$0xff]  ;;  %v140_v13 = vld [vmem:[%s4515_s2 + $0x28] sm:$0xff]  ;;  %v81_v14 = vpack.c.bf16 %v36_v10, %v35_v9  ;;  %v50_v15 = vld [vmem:[%s4513_s0 + $0x98] sm:$0xff] }
  0x12   :  { %v65_v16 = vld [vmem:[%s4513_s0 + $0x110] sm:$0xff]  ;;  %v66_v17 = vld [vmem:[%s4513_s0 + $0x118] sm:$0xff]  ;;  %v511_v21 = vsel %vm407_vm0, %v97_v8, 0  ;;  %v88_v22 = vpack.c.bf16 %v50_v15, %v49_v12  ;;  %v135_v26 = vld [vmem:[%s4515_s2] sm:$0xff] }
  0x13   :  { %v137_v18 = vld [vmem:[%s4515_s2 + $0x10] sm:$0xff]  ;;  %v138_v19 = vld [vmem:[%s4515_s2 + $0x18] sm:$0xff]  ;;  %v463_v20 = vsel %vm407_vm0, %v81_v14, 0  ;;  %v96_v23 = vpack.c.bf16 %v66_v17, %v65_v16  ;;  %v136_v27 = vld [vmem:[%s4515_s2 + $0x8] sm:$0xff] }
  0x14   :  { %224 = vperm.xlu1 %2447, %v146_v53   ;;  %v33_v24 = vld [vmem:[%s4513_s0 + $0x10] sm:$0xff]  ;;  %v34_v25 = vld [vmem:[%s4513_s0 + $0x18] sm:$0xff]  ;;  %v47_v29 = vld [vmem:[%s4513_s0 + $0x80] sm:$0xff] }
  0x15   :  { %209 = vperm.xlu0 %2446, %v143_v60   ;;  %v80_v28 = vpack.c.bf16 %v34_v25, %v33_v24  ;;  %v48_v30 = vld [vmem:[%s4513_s0 + $0x88] sm:$0xff]  ;;  %v63_v31 = vld [vmem:[%s4513_s0 + $0x100] sm:$0xff]  ;;  %v165_v33 = vld [vmem:[%s4515_s2 + $0xf0] sm:$0xff]  ;;  %v508_v37 = vsel %vm407_vm0, %v96_v23, 0 }
  0x16   :  { %2384 = vmatpush3.bf16.xpose.msra.mxu1 %v520_v39  ;;  %v64_v32 = vld [vmem:[%s4513_s0 + $0x108] sm:$0xff]  ;;  %v166_v34 = vld [vmem:[%s4515_s2 + $0xf8] sm:$0xff]  ;;  %v163_v42 = vld [vmem:[%s4515_s2 + $0xe0] sm:$0xff] }
  0x17   :  { %2178 = vmatpush3.bf16.xpose.msra.mxu0 %v472_v38  ;;  %2438 = vmatprep.subr.msk.bf16.mxu1 %vm407_vm0, %v99_v41  ;;  %v460_v35 = vsel %vm407_vm0, %v80_v28, 0  ;;  %v87_v38 = vpack.c.bf16 %v48_v30, %v47_v29  ;;  %v95_v39 = vpack.c.bf16 %v64_v32, %v63_v31  ;;  %v32_v41 = vld [vmem:[%s4513_s0 + $0x8] sm:$0xff]  ;;  %v161_v45 = vld [vmem:[%s4515_s2 + $0xd0] sm:$0xff]  ;;  %v162_v46 = vld [vmem:[%s4515_s2 + $0xd8] sm:$0xff] }
  0x18   :  { %2430 = vmatprep.subr.msk.bf16.mxu0 %vm407_vm0, %v91_v40  ;;  %214 = vperm.xlu1 %2447, %v144_v61   ;;  %v31_v40 = vld [vmem:[%s4513_s0] sm:$0xff]  ;;  %v164_v43 = vld [vmem:[%s4515_s2 + $0xe8] sm:$0xff]  ;;  %v157_v52 = vld [vmem:[%s4515_s2 + $0xb0] sm:$0xff] }
  0x19   :  { %199 = vperm.xlu0 %2446, %v141_v3   ;;  %v79_v44 = vpack.c.bf16 %v32_v41, %v31_v40  ;;  %v505_v48 = vsel %vm407_vm0, %v95_v39, 0  ;;  %v159_v49 = vld [vmem:[%s4515_s2 + $0xc0] sm:$0xff]  ;;  %v160_v50 = vld [vmem:[%s4515_s2 + $0xc8] sm:$0xff] }
  0x1a   :  { %v2449_v51 = vld [vmem:[%s4514_s1 + $0x8] sm:$0xff]  }
  0x1b   :  { %v457_v47 = vsel %vm407_vm0, %v79_v44, 0 }
  0x1c   :  { %204 = vperm.xlu1 %2447, %v142_v4  }
  0x1d   :  { %189 = vperm.xlu0 %2446, %v139_v11  }
  0x1e   :  { %2386 = vmatpush3.bf16.xpose.msra.mxu1 %v517_v55 }
  0x1f   :  { %2180 = vmatpush3.bf16.xpose.msra.mxu0 %v469_v54  ;;  %2439 = vmatprep.subr.msk.bf16.mxu1 %vm407_vm0, %v98_v57 }
  0x20   :  { %2431 = vmatprep.subr.msk.bf16.mxu0 %vm407_vm0, %v90_v56  ;;  %194 = vperm.xlu1 %2447, %v140_v13  }
  0x21   :  { %179 = vperm.xlu0 %2446, %v137_v18  }
  0x24   :  { %184 = vperm.xlu1 %2447, %v138_v19  }
  0x25   :  { %169 = vperm.xlu0 %2446, %v135_v26  }
  0x26   :  { %2388 = vmatpush3.bf16.xpose.msra.mxu1 %v514_v6 }
  0x27   :  { %2182 = vmatpush3.bf16.xpose.msra.mxu0 %v466_v5  ;;  %2440 = vmatprep.subr.msk.bf16.mxu1 %vm407_vm0, %v97_v8 }
  0x28   :  { %2432 = vmatprep.subr.msk.bf16.mxu0 %vm407_vm0, %v89_v7  ;;  %174 = vperm.xlu1 %2447, %v136_v27  }
  0x29   :  { %319 = vperm.xlu0 %2446, %v165_v33  }
  0x2c   :  { %324 = vperm.xlu1 %2447, %v166_v34  }
  0x2d   :  { %309 = vperm.xlu0 %2446, %v163_v42  }
  0x2e   :  { %2390 = vmatpush3.bf16.xpose.msra.mxu1 %v511_v21 }
  0x2f   :  { %2184 = vmatpush3.bf16.xpose.msra.mxu0 %v463_v20  ;;  %2441 = vmatprep.subr.msk.bf16.mxu1 %vm407_vm0, %v96_v23 }
  0x30   :  { %2433 = vmatprep.subr.msk.bf16.mxu0 %vm407_vm0, %v88_v22  ;;  %314 = vperm.xlu1 %2447, %v164_v43  }
  0x31   :  { %299 = vperm.xlu0 %2446, %v161_v45  }
  0x34   :  { %304 = vperm.xlu1 %2447, %v162_v46  }
  0x35   :  { %289 = vperm.xlu0 %2446, %v159_v49  }
  0x36   :  { %2392 = vmatpush3.bf16.xpose.msra.mxu1 %v508_v37 }
  0x37   :  { %2186 = vmatpush3.bf16.xpose.msra.mxu0 %v460_v35  ;;  %2442 = vmatprep.subr.msk.bf16.mxu1 %vm407_vm0, %v95_v39 }
  0x38   :  { %2434 = vmatprep.subr.msk.bf16.mxu0 %vm407_vm0, %v87_v38  ;;  %294 = vperm.xlu1 %2447, %v160_v50  }
  0x3e   :  { %2394 = vmatpush3.bf16.xpose.msra.mxu1 %v505_v48 }
  0x3f   :  { %2188 = vmatpush3.bf16.xpose.msra.mxu0 %v457_v47 }
  0x40   :  { %15 = vsyncpa [#allocation5], 0  ;;  %v2450_v53 = vld [vmem:[%s4514_s1 + $0x10] sm:$0xff]   ;;  %279 = vperm.xlu0 %2446, %v157_v52   ;;  %v158_v54 = vld [vmem:[%s4515_s2 + $0xb8] sm:$0xff] }
  0x41   :  { %v155_v55 = vld [vmem:[%s4515_s2 + $0xa0] sm:$0xff]  ;;  %284 = vperm.xlu1 %2447, %v158_v54   ;;  %v156_v56 = vld [vmem:[%s4515_s2 + $0xa8] sm:$0xff]  ;;  %v153_v57 = vld [vmem:[%s4515_s2 + $0x90] sm:$0xff] }
  0x42   :  { %v2452_v58 = vld [vmem:[%s4514_s1 + $0x20] sm:$0xff]   ;;  %v154_v59 = vld [vmem:[%s4515_s2 + $0x98] sm:$0xff]  ;;  %v152_v61 = vld [vmem:[%s4515_s2 + $0x88] sm:$0xff] }
  0x43   :  { %v151_v60 = vld [vmem:[%s4515_s2 + $0x80] sm:$0xff]  ;;  %v2453_v62 = vld [vmem:[%s4514_s1 + $0x28] sm:$0xff]   ;;  %v1072_v63 = vld [vmem:[%s4517_s4 + $0x70] sm:$0xff] }
  0x44   :  { %269 = vperm.xlu0 %2446, %v155_v55   ;;  %v2454_v0 = vld [vmem:[%s4514_s1 + $0x30] sm:$0xff]   ;;  %v1073_v1 = vld [vmem:[%s4517_s4 + $0x78] sm:$0xff]  ;;  %v1070_v2 = vld [vmem:[%s4517_s4 + $0x60] sm:$0xff] }
  0x45   :  { %2396 = vmatmul.mubr.msk.bf16.vlgmr.msra.gmra.mxu1 %vm407_vm0, %v2449_v51  ;;  %274 = vperm.xlu1 %2447, %v156_v56   ;;  %v1071_v3 = vld [vmem:[%s4517_s4 + $0x68] sm:$0xff]  ;;  %v2455_v4 = vld [vmem:[%s4514_s1 + $0x38] sm:$0xff]   ;;  %v1068_v5 = vld [vmem:[%s4517_s4 + $0x50] sm:$0xff] }
  0x46   :  { %2190 = vmatmul.mubr.msk.bf16.vlgmr.msra.gmra.mxu0 %vm407_vm0, %v3081_v36  ;;  %2399 = vmatprep.mubr.msk.bf16.mxu1 %vm407_vm0, %v2450_v53  ;;  %v2451_v36 = vld [vmem:[%s4514_s1 + $0x18] sm:$0xff]   ;;  %v3335_v6 = vld [vmem:[%s4514_s1 + $0x40] sm:$0xff]   ;;  %v1067_v9 = vld [vmem:[%s4517_s4 + $0x48] sm:$0xff] }
  0x47   :  { %2191 = vmatprep.mubr.msk.bf16.mxu0 %vm407_vm0, %v2449_v51  ;;  %v1069_v7 = vld [vmem:[%s4517_s4 + $0x58] sm:$0xff]  ;;  %v1066_v8 = vld [vmem:[%s4517_s4 + $0x40] sm:$0xff]  ;;  %v3354_v10 = vld [vmem:[%s4514_s1 + $0x48] sm:$0xff]  }
  0x48   :  { %259 = vperm.xlu0 %2446, %v153_v57   ;;  %v1064_v11 = vld [vmem:[%s4517_s4 + $0x30] sm:$0xff]  ;;  %v1065_v13 = vld [vmem:[%s4517_s4 + $0x38] sm:$0xff]  ;;  %v1062_v14 = vld [vmem:[%s4517_s4 + $0x20] sm:$0xff] }
  0x49   :  { %264 = vperm.xlu1 %2447, %v154_v59   ;;  %v3362_v12 = vld [vmem:[%s4514_s1 + $0x50] sm:$0xff]   ;;  %v1063_v15 = vld [vmem:[%s4517_s4 + $0x28] sm:$0xff]  ;;  %v3382_v16 = vld [vmem:[%s4514_s1 + $0x58] sm:$0xff]  }
  0x4a   :  { %v1060_v17 = vld [vmem:[%s4517_s4 + $0x10] sm:$0xff]  ;;  %v3390_v18 = vld [vmem:[%s4514_s1 + $0x60] sm:$0xff]   ;;  %v1061_v19 = vld [vmem:[%s4517_s4 + $0x18] sm:$0xff] }
  0x4b   :  { %v1058_v20 = vld [vmem:[%s4517_s4] sm:$0xff]  ;;  %v1059_v21 = vld [vmem:[%s4517_s4 + $0x8] sm:$0xff]  ;;  %v1088_v23 = vld [vmem:[%s4517_s4 + $0xf0] sm:$0xff] }
  0x4c   :  { %249 = vperm.xlu0 %2446, %v151_v60   ;;  %v2461_v22 = vld [vmem:[%s4514_s1 + $0x68] sm:$0xff]   ;;  %v2462_v24 = vld [vmem:[%s4514_s1 + $0x70] sm:$0xff]   ;;  %v1089_v25 = vld [vmem:[%s4517_s4 + $0xf8] sm:$0xff] }
  0x4d   :  { %2400 = vmatmul.mubr.msk.bf16.gmra.mxu1 %vm407_vm0, %v2451_v36  ;;  %254 = vperm.xlu1 %2447, %v152_v61   ;;  %v1086_v26 = vld [vmem:[%s4517_s4 + $0xe0] sm:$0xff]  ;;  %v1087_v27 = vld [vmem:[%s4517_s4 + $0xe8] sm:$0xff]  ;;  %v2463_v28 = vld [vmem:[%s4514_s1 + $0x78] sm:$0xff]  }
  0x4e   :  { %2192 = vmatmul.mubr.msk.bf16.gmra.mxu0 %vm407_vm0, %v2449_v51  ;;  %2403 = vmatprep.mubr.msk.bf16.mxu1 %vm407_vm0, %v2452_v58  ;;  %v1084_v29 = vld [vmem:[%s4517_s4 + $0xd0] sm:$0xff]  ;;  %v1085_v30 = vld [vmem:[%s4517_s4 + $0xd8] sm:$0xff]  ;;  %v1082_v31 = vld [vmem:[%s4517_s4 + $0xc0] sm:$0xff] }
  0x4f   :  { %2193 = vmatprep.mubr.msk.bf16.mxu0 %vm407_vm0, %v2450_v53  ;;  %v1083_v32 = vld [vmem:[%s4517_s4 + $0xc8] sm:$0xff]  ;;  %v1080_v33 = vld [vmem:[%s4517_s4 + $0xb0] sm:$0xff]  ;;  %v1081_v34 = vld [vmem:[%s4517_s4 + $0xb8] sm:$0xff] }
  0x50   :  { %1162 = vperm.xlu0 %2446, %v1072_v63   ;;  %v1078_v35 = vld [vmem:[%s4517_s4 + $0xa0] sm:$0xff]  ;;  %v1079_v37 = vld [vmem:[%s4517_s4 + $0xa8] sm:$0xff]  ;;  %v1076_v38 = vld [vmem:[%s4517_s4 + $0x90] sm:$0xff] }
  0x51   :  { %1167 = vperm.xlu1 %2447, %v1073_v1   ;;  %v1077_v39 = vld [vmem:[%s4517_s4 + $0x98] sm:$0xff]  ;;  %v1074_v40 = vld [vmem:[%s4517_s4 + $0x80] sm:$0xff]  ;;  %v1075_v41 = vld [vmem:[%s4517_s4 + $0x88] sm:$0xff] }
  0x52   :  { %v1909_v42 = vld [vmem:[%s4519_s6] sm:$0xff] }
  0x53   :  { %v2466_v52 = vld [vmem:[%s4516_s3 + $0x4] ss:$8 sps:$4 sm:$0xff]  }
  0x54   :  { %1152 = vperm.xlu0 %2446, %v1070_v2  }
  0x55   :  { %2404 = vmatmul.mubr.msk.bf16.gmra.mxu1 %vm407_vm0, %v2453_v62  ;;  %1157 = vperm.xlu1 %2447, %v1071_v3  }
  0x56   :  { %2194 = vmatmul.mubr.msk.bf16.gmra.mxu0 %vm407_vm0, %v2450_v53  ;;  %2407 = vmatprep.mubr.msk.bf16.mxu1 %vm407_vm0, %v2454_v0 }
  0x57   :  { %2195 = vmatprep.mubr.msk.bf16.mxu0 %vm407_vm0, %v2451_v36 }
  0x58   :  { %1142 = vperm.xlu0 %2446, %v1068_v5  }
  0x59   :  { %1147 = vperm.xlu1 %2447, %v1069_v7  }
  0x5c   :  { %1132 = vperm.xlu0 %2446, %v1066_v8  }
  0x5d   :  { %2408 = vmatmul.mubr.msk.bf16.gmra.mxu1 %vm407_vm0, %v2455_v4  ;;  %1137 = vperm.xlu1 %2447, %v1067_v9  }
  0x5e   :  { %2196 = vmatmul.mubr.msk.bf16.gmra.mxu0 %vm407_vm0, %v2451_v36  ;;  %2411 = vmatprep.mubr.msk.bf16.mxu1 %vm407_vm0, %v3335_v6 }
  0x5f   :  { %2197 = vmatprep.mubr.msk.bf16.mxu0 %vm407_vm0, %v2452_v58 }
  0x60   :  { %1122 = vperm.xlu0 %2446, %v1064_v11  }
  0x61   :  { %1127 = vperm.xlu1 %2447, %v1065_v13  }
  0x64   :  { %1112 = vperm.xlu0 %2446, %v1062_v14  }
  0x65   :  { %2412 = vmatmul.mubr.msk.bf16.gmra.mxu1 %vm407_vm0, %v3354_v10  ;;  %1117 = vperm.xlu1 %2447, %v1063_v15  }
  0x66   :  { %2198 = vmatmul.mubr.msk.bf16.gmra.mxu0 %vm407_vm0, %v2452_v58  ;;  %2415 = vmatprep.mubr.msk.bf16.mxu1 %vm407_vm0, %v3362_v12 }
  0x67   :  { %2199 = vmatprep.mubr.msk.bf16.mxu0 %vm407_vm0, %v2453_v62 }
  0x68   :  { %1102 = vperm.xlu0 %2446, %v1060_v17  }
  0x69   :  { %1107 = vperm.xlu1 %2447, %v1061_v19  }
  0x6c   :  { %1092 = vperm.xlu0 %2446, %v1058_v20  }
  0x6d   :  { %2416 = vmatmul.mubr.msk.bf16.gmra.mxu1 %vm407_vm0, %v3382_v16  ;;  %1097 = vperm.xlu1 %2447, %v1059_v21  }
  0x6e   :  { %2200 = vmatmul.mubr.msk.bf16.gmra.mxu0 %vm407_vm0, %v2453_v62  ;;  %2419 = vmatprep.mubr.msk.bf16.mxu1 %vm407_vm0, %v3390_v18 }
  0x6f   :  { %2201 = vmatprep.mubr.msk.bf16.mxu0 %vm407_vm0, %v2454_v0 }
  0x70   :  { %1242 = vperm.xlu0 %2446, %v1088_v23  }
  0x71   :  { %1247 = vperm.xlu1 %2447, %v1089_v25  }
  0x74   :  { %1232 = vperm.xlu0 %2446, %v1086_v26  }
  0x75   :  { %2420 = vmatmul.mubr.msk.bf16.gmra.mxu1 %vm407_vm0, %v2461_v22  ;;  %1237 = vperm.xlu1 %2447, %v1087_v27  }
  0x76   :  { %2202 = vmatmul.mubr.msk.bf16.gmra.mxu0 %vm407_vm0, %v2454_v0  ;;  %2423 = vmatprep.mubr.msk.bf16.mxu1 %vm407_vm0, %v2462_v24 }
  0x77   :  { %2203 = vmatprep.mubr.msk.bf16.mxu0 %vm407_vm0, %v2455_v4 }
  0x78   :  { %1222 = vperm.xlu0 %2446, %v1084_v29  }
  0x79   :  { %1227 = vperm.xlu1 %2447, %v1085_v30  }
  0x7c   :  { %1212 = vperm.xlu0 %2446, %v1082_v31  }
  0x7d   :  { %2424 = vmatmul.mubr.msk.bf16.gmra.mxu1 %vm407_vm0, %v2463_v28  ;;  %1217 = vperm.xlu1 %2447, %v1083_v32  }
  0x7e   :  { %2204 = vmatmul.mubr.msk.bf16.gmra.mxu0 %vm407_vm0, %v2455_v4  ;;  %1442 = vmatprep.mubr.bf16.mxu1 %v2466_v52 }
  0x7f   :  { %2205 = vmatprep.mubr.msk.bf16.mxu0 %vm407_vm0, %v3335_v6 }
  0x80   :  { %1202 = vperm.xlu0 %2446, %v1080_v33  }
  0x81   :  { %1207 = vperm.xlu1 %2447, %v1081_v34  }
  0x84   :  { %1192 = vperm.xlu0 %2446, %v1078_v35   ;;  %v3499_v43 = vpop.permute.xlu0 %239 }
  0x85   :  { %1197 = vperm.xlu1 %2447, %v1079_v37  }
  0x86   :  { %2206 = vmatmul.mubr.msk.bf16.gmra.mxu0 %vm407_vm0, %v3335_v6  ;;  %v3501_v44 = vpop.permute.xlu1 %229 }
  0x87   :  { %2207 = vmatprep.mubr.msk.bf16.mxu0 %vm407_vm0, %v3354_v10 }
  0x88   :  { %1182 = vperm.xlu0 %2446, %v1076_v38   ;;  %v3503_v45 = vpop.permute.xlu0 %244 }
  0x89   :  { %1187 = vperm.xlu1 %2447, %v1077_v39  }
  0x8b   :  { %v3505_v46 = vpop.permute.xlu1 %234 }
  0x8c   :  { %1172 = vperm.xlu0 %2446, %v1074_v40   ;;  %v3507_v47 = vpop.permute.xlu0 %219 }
  0x8d   :  { %1177 = vperm.xlu1 %2447, %v1075_v41  }
  0x8e   :  { %2208 = vmatmul.mubr.msk.bf16.gmra.mxu0 %vm407_vm0, %v3354_v10 }
  0x8f   :  { %2209 = vmatprep.mubr.msk.bf16.mxu0 %vm407_vm0, %v3362_v12  ;;  %v3509_v48 = vpop.permute.xlu1 %224 }
  0x90   :  { %1912 = vperm.xlu0 %2446, %v1909_v42   ;;  %v3511_v49 = vpop.permute.xlu0 %209 }
  0x93   :  { %v3513_v50 = vpop.permute.xlu1 %214 }
  0x94   :  { %v3515_v51 = vpop.permute.xlu0 %199 }
  0x96   :  { %2210 = vmatmul.mubr.msk.bf16.gmra.mxu0 %vm407_vm0, %v3362_v12 }
  0x97   :  { %2211 = vmatprep.mubr.msk.bf16.mxu0 %vm407_vm0, %v3382_v16  ;;  %v3520_v53 = vpop.permute.xlu1 %204 }
  0x98   :  { %v3522_v54 = vpop.permute.xlu0 %189 }
  0x9b   :  { %v3524_v55 = vpop.permute.xlu1 %194 }
  0x9c   :  { %v3526_v56 = vpop.permute.xlu0 %179 }
  0x9e   :  { %2212 = vmatmul.mubr.msk.bf16.gmra.mxu0 %vm407_vm0, %v3382_v16 }
  0x9f   :  { %2213 = vmatprep.mubr.msk.bf16.mxu0 %vm407_vm0, %v3390_v18  ;;  %v3528_v36 = vpop.permute.xlu1 %184 }
  0xa0   :  { %v3530_v57 = vpop.permute.xlu0 %169 }
  0xa3   :  { %v3536_v0 = vpop.permute.xlu1 %174 }
  0xa4   :  { %v3539_v4 = vpop.permute.xlu0 %319 }
  0xa5   :  { %4579 = vst [vmem:[#allocation8_spill] sm:$0xff] %v3539_v4 }
  0xa6   :  { %2214 = vmatmul.mubr.msk.bf16.gmra.mxu0 %vm407_vm0, %v3390_v18 }
  0xa7   :  { %2215 = vmatprep.mubr.msk.bf16.mxu0 %vm407_vm0, %v2461_v22 }
  0xa8   :  { %v3550_v16 = vpop.permute.xlu0 %309 }
  0xa9   :  { %4580 = vst [vmem:[#allocation9_spill] sm:$0xff] %v3550_v16 }
  0xae   :  { %2216 = vmatmul.mubr.msk.bf16.gmra.mxu0 %vm407_vm0, %v2461_v22 }
  0xaf   :  { %2217 = vmatprep.mubr.msk.bf16.mxu0 %vm407_vm0, %v2462_v24 }
  0xb6   :  { %2218 = vmatmul.mubr.msk.bf16.gmra.mxu0 %vm407_vm0, %v2462_v24 }
  0xb7   :  { %2219 = vmatprep.mubr.msk.bf16.mxu0 %vm407_vm0, %v2463_v28 }
  0xbe   :  { %2220 = vmatmul.mubr.msk.bf16.gmra.mxu0 %vm407_vm0, %v2463_v28  ;;  %v3558_v28 = vpop.permute.xlu0 %299 }
  0xbf   :  { %1635 = vmatprep.mubr.bf16.mxu0 %v2466_v52  ;;  %4582 = vst [vmem:[#allocation11_spill] sm:$0xff] %v3558_v28 }
  0xc2   :  { %v3578_v52 = vpop.permute.xlu0 %289 }
  0xc3   :  { %4588 = vst [vmem:[#allocation17_spill] sm:$0xff] %v3578_v52 }
 0x105   :  { %v2397_v59 = vpop.f32.mrf.mxu1 }
 0x106   :  { %v562_v58 = vpop.f32.mrf.mxu0  ;;  %v764_v61 = vadd.f32 %v2397_v59, %v3526_v56 }
 0x107   :  { %v563_v60 = vadd.f32 %v562_v58, %v3530_v57  ;;  %v755_v63 = vpop.f32.mrf.mxu1 }
 0x108   :  { %v3534_v62 = vpop.f32.mrf.mxu0  ;;  %v756_v1 = vadd.f32 %v755_v63, %v3530_v57  ;;  %v3584_v63 = vpop.permute.xlu1 %324 }
 0x109   :  { %2514 = vtanh.f32 %v563_v60  ;;  %v2398_v3 = vpop.f32.mrf.mxu1  ;;  %4590 = vst [vmem:[#allocation19_spill] sm:$0xff] %v3584_v63 }
 0x10a   :  { %v566_v2 = vpop.f32.mrf.mxu0  ;;  %2516 = vtanh.f32 %v764_v61  ;;  %v767_v6 = vadd.f32 %v2398_v3, %v3528_v36 }
 0x10b   :  { %v567_v5 = vadd.f32 %v566_v2, %v3536_v0  ;;  %2518 = vtanh.f32 %v756_v1  ;;  %v758_v8 = vpop.f32.mrf.mxu1 }
 0x10c   :  { %v3543_v7 = vpop.f32.mrf.mxu0  ;;  %v759_v9 = vadd.f32 %v758_v8, %v3536_v0 }
 0x10d   :  { %2520 = vtanh.f32 %v567_v5  ;;  %v2401_v11 = vpop.f32.mrf.mxu1 }
 0x10e   :  { %2522 = vtanh.f32 %v767_v6  ;;  %v572_v10 = vpop.f32.mrf.mxu0  ;;  %v780_v13 = vadd.f32 %v2401_v11, %v3515_v51 }
 0x10f   :  { %v573_v12 = vadd.f32 %v572_v10, %v3526_v56  ;;  %2524 = vtanh.f32 %v759_v9  ;;  %v771_v15 = vpop.f32.mrf.mxu1 }
 0x110   :  { %v3548_v14 = vpop.f32.mrf.mxu0  ;;  %v772_v17 = vadd.f32 %v771_v15, %v3522_v54  ;;  %v3597_v15 = vpop.permute.xlu0 %279 }
 0x111   :  { %2526 = vtanh.f32 %v573_v12  ;;  %v2402_v19 = vpop.f32.mrf.mxu1  ;;  %4594 = vst [vmem:[#allocation23_spill] sm:$0xff] %v3597_v15 }
 0x112   :  { %v576_v18 = vpop.f32.mrf.mxu0  ;;  %2528 = vtanh.f32 %v780_v13  ;;  %v783_v21 = vadd.f32 %v2402_v19, %v3520_v53 }
 0x113   :  { %v577_v20 = vadd.f32 %v576_v18, %v3528_v36  ;;  %2530 = vtanh.f32 %v772_v17  ;;  %v774_v23 = vpop.f32.mrf.mxu1 }
 0x114   :  { %v578_v22 = vpop.f32.mrf.mxu0  ;;  %v775_v24 = vadd.f32 %v774_v23, %v3524_v55  ;;  %v3607_v23 = vpop.permute.xlu1 %314 }
 0x115   :  { %2532 = vtanh.f32 %v577_v20  ;;  %v2405_v26 = vpop.f32.mrf.mxu1  ;;  %v579_v2 = vadd.f32 %v578_v22, %v3528_v36  ;;  %4596 = vst [vmem:[#allocation25_spill] sm:$0xff] %v3607_v23 }
 0x116   :  { %2534 = vtanh.f32 %v783_v21  ;;  %v582_v25 = vpop.f32.mrf.mxu0  ;;  %v3556_v27 = vpop.eup %2514  ;;  %v796_v10 = vadd.f32 %v2405_v26, %v3507_v47 }
 0x117   :  { %4581 = vst [vmem:[#allocation10_spill] sm:$0xff] %v3556_v27  ;;  %v3560_v29 = vpop.eup %2516  ;;  %2536 = vtanh.f32 %v775_v24  ;;  %v787_v31 = vpop.f32.mrf.mxu1  ;;  %v583_v8 = vadd.f32 %v582_v25, %v3522_v54 }
 0x118   :  { %4583 = vst [vmem:[#allocation12_spill] sm:$0xff] %v3560_v29  ;;  %v3562_v30 = vpop.f32.mrf.mxu0  ;;  %v3564_v32 = vpop.eup %2518  ;;  %v788_v17 = vadd.f32 %v787_v31, %v3511_v49  ;;  %2538 = vtanh.f32 %v579_v2 }
 0x119   :  { %4584 = vst [vmem:[#allocation13_spill] sm:$0xff] %v3564_v32  ;;  %v2406_v35 = vpop.f32.mrf.mxu1  ;;  %2540 = vtanh.f32 %v583_v8  ;;  %v3617_v8 = vpop.permute.xlu0 %269 }
 0x11a   :  { %v3566_v33 = vpop.eup %2520  ;;  %v3568_v34 = vpop.f32.mrf.mxu0  ;;  %v799_v18 = vadd.f32 %v2406_v35, %v3509_v48  ;;  %2542 = vtanh.f32 %v796_v10 }
 0x11b   :  { %4585 = vst [vmem:[#allocation14_spill] sm:$0xff] %v3566_v33  ;;  %v3570_v37 = vpop.eup %2522  ;;  %v790_v40 = vpop.f32.mrf.mxu1  ;;  %2544 = vtanh.f32 %v788_v17 }
 0x11c   :  { %4586 = vst [vmem:[#allocation15_spill] sm:$0xff] %v3570_v37  ;;  %v588_v39 = vpop.f32.mrf.mxu0  ;;  %v3576_v42 = vpop.eup %2524  ;;  %v791_v25 = vadd.f32 %v790_v40, %v3513_v50  ;;  %2546 = vtanh.f32 %v799_v18 }
 0x11d   :  { %4587 = vst [vmem:[#allocation16_spill] sm:$0xff] %v3576_v42  ;;  %v2409_v59 = vpop.f32.mrf.mxu1  ;;  %v589_v24 = vadd.f32 %v588_v39, %v3524_v55  ;;  %v3625_v17 = vpop.permute.xlu1 %304 }
 0x11e   :  { %v592_v58 = vpop.f32.mrf.mxu0  ;;  %v3582_v61 = vpop.eup %2526  ;;  %v812_v38 = vadd.f32 %v2409_v59, %v3499_v43  ;;  %4597 = vst [vmem:[#allocation26_spill] sm:$0xff] %v3625_v17 }
 0x11f   :  { %4589 = vst [vmem:[#allocation18_spill] sm:$0xff] %v3582_v61  ;;  %v3586_v1 = vpop.eup %2528  ;;  %v803_v5 = vpop.f32.mrf.mxu1  ;;  %v593_v2 = vadd.f32 %v592_v58, %v3515_v51  ;;  %2548 = vtanh.f32 %v589_v24 }
 0x120   :  { %4591 = vst [vmem:[#allocation20_spill] sm:$0xff] %v3586_v1  ;;  %v594_v3 = vpop.f32.mrf.mxu0  ;;  %v3589_v6 = vpop.eup %2530  ;;  %2550 = vtanh.f32 %v791_v25  ;;  %v804_v40 = vadd.f32 %v803_v5, %v3501_v44 }
 0x121   :  { %4592 = vst [vmem:[#allocation21_spill] sm:$0xff] %v3589_v6  ;;  %v2410_v12 = vpop.f32.mrf.mxu1  ;;  %v595_v39 = vadd.f32 %v594_v3, %v3515_v51  ;;  %2552 = vtanh.f32 %v593_v2  ;;  %v3633_v25 = vpop.permute.xlu0 %259 }
 0x122   :  { %v3592_v9 = vpop.eup %2532  ;;  %v596_v11 = vpop.f32.mrf.mxu0  ;;  %2554 = vtanh.f32 %v812_v38  ;;  %v815_v59 = vadd.f32 %v2410_v12, %v3503_v45 }
 0x123   :  { %4593 = vst [vmem:[#allocation22_spill] sm:$0xff] %v3592_v9  ;;  %v3595_v13 = vpop.eup %2534  ;;  %v806_v20 = vpop.f32.mrf.mxu1  ;;  %v597_v58 = vadd.f32 %v596_v11, %v3520_v53  ;;  %2556 = vtanh.f32 %v595_v39 }
 0x124   :  { %v598_v19 = vpop.f32.mrf.mxu0  ;;  %v3605_v22 = vpop.eup %2536  ;;  %2558 = vtanh.f32 %v804_v40  ;;  %v807_v3 = vadd.f32 %v806_v20, %v3505_v46 }
 0x125   :  { %4595 = vst [vmem:[#allocation24_spill] sm:$0xff] %v3605_v22  ;;  %v2413_v31 = vpop.f32.mrf.mxu1  ;;  %v599_v51 = vadd.f32 %v598_v19, %v3520_v53  ;;  %2560 = vtanh.f32 %v597_v58  ;;  %v3639_v21 = vpop.eup %2538 }
 0x126   :  { %v602_v26 = vpop.f32.mrf.mxu0  ;;  %2562 = vtanh.f32 %v815_v59  ;;  %v828_v38 = vadd.f32 %v2413_v31, %v3633_v25  ;;  %4598 = vst [vmem:[#allocation27_spill] sm:$0xff] %v3639_v21  ;;  %v3641_v39 = vpop.permute.xlu1 %294 }
 0x127   :  { %v3615_v36 = vpop.f32.mrf.mxu1  ;;  %v603_v2 = vadd.f32 %v602_v26, %v3511_v49  ;;  %4599 = vst [vmem:[#allocation28_spill] sm:$0xff] %v3641_v39  ;;  %2564 = vtanh.f32 %v599_v51  ;;  %v3644_v19 = vpop.eup %2540 }
 0x128   :  { %v604_v60 = vpop.f32.mrf.mxu0  ;;  %4600 = vst [vmem:[#allocation29_spill] sm:$0xff] %v3644_v19  ;;  %2566 = vtanh.f32 %v807_v3  ;;  %v3649_v58 = vpop.eup %2542 }
 0x129   :  { %v3623_v41 = vpop.f32.mrf.mxu1  ;;  %v605_v53 = vadd.f32 %v604_v60, %v3511_v49  ;;  %2568 = vtanh.f32 %v603_v2  ;;  %v3652_v59 = vpop.eup %2544 }
 0x12a   :  { %v3621_v10 = vpop.f32.mrf.mxu0  ;;  %2570 = vtanh.f32 %v828_v38  ;;  %v3657_v60 = vpop.eup %2546 }
 0x12b   :  { %v3629_v35 = vpop.f32.mrf.mxu1  ;;  %2572 = vtanh.f32 %v605_v53  ;;  %v3665_v38 = vpop.permute.xlu1 %284 }
 0x12c   :  { %v608_v18 = vpop.f32.mrf.mxu0  ;;  %v3660_v3 = vpop.eup %2548  ;;  %4602 = vst [vmem:[#allocation31_spill] sm:$0xff] %v3665_v38 }
 0x12d   :  { %v2417_v24 = vpop.f32.mrf.mxu1  ;;  %v609_v20 = vadd.f32 %v608_v18, %v3513_v50  ;;  %4601 = vst [vmem:[#allocation30_spill] sm:$0xff] %v3660_v3  ;;  %v3663_v32 = vpop.eup %2550 }
 0x12e   :  { %v612_v5 = vpop.f32.mrf.mxu0  ;;  %v844_v51 = vadd.f32 %v2417_v24, %v3597_v15  ;;  %v3668_v15 = vpop.eup %2552 }
 0x12f   :  { %v3637_v12 = vpop.f32.mrf.mxu1  ;;  %v613_v31 = vadd.f32 %v612_v5, %v3507_v47  ;;  %2574 = vtanh.f32 %v609_v20  ;;  %v3671_v42 = vpop.eup %2554 }
 0x130   :  { %v614_v11 = vpop.f32.mrf.mxu0 }
 0x131   :  { %v3647_v26 = vpop.f32.mrf.mxu1  ;;  %v615_v18 = vadd.f32 %v614_v11, %v3507_v47  ;;  %2576 = vtanh.f32 %v613_v31 }
 0x132   :  { %v616_v40 = vpop.f32.mrf.mxu0  ;;  %2578 = vtanh.f32 %v844_v51 }
 0x133   :  { %v3655_v49 = vpop.f32.mrf.mxu1  ;;  %v617_v2 = vadd.f32 %v616_v40, %v3509_v48  ;;  %2580 = vtanh.f32 %v615_v18  ;;  %v3674_v40 = vpop.eup %2556 }
 0x134   :  { %v618_v27 = vpop.f32.mrf.mxu0 }
 0x135   :  { %v2421_v5 = vpop.f32.mrf.mxu1  ;;  %v619_v24 = vadd.f32 %v618_v27, %v3509_v48  ;;  %2582 = vtanh.f32 %v617_v2  ;;  %v3677_v48 = vpop.eup %2558 }
 0x136   :  { %v622_v33 = vpop.f32.mrf.mxu0  ;;  %v860_v20 = vadd.f32 %v2421_v5, %v3558_v28  ;;  %v3684_v5 = vpop.permute.xlu1 %274 }
 0x137   :  { %v623_v53 = vadd.f32 %v622_v33, %v3501_v44  ;;  %v851_v11 = vpop.f32.mrf.mxu1  ;;  %2584 = vtanh.f32 %v619_v24  ;;  %v3680_v33 = vpop.eup %2560 }
 0x138   :  { %v624_v47 = vpop.f32.mrf.mxu0  ;;  %v3682_v18 = vpop.eup %2562 }
 0x139   :  { %v625_v61 = vadd.f32 %v624_v47, %v3501_v44  ;;  %v2422_v9 = vpop.f32.mrf.mxu1  ;;  %2586 = vtanh.f32 %v623_v53  ;;  %v3687_v44 = vpop.eup %2564 }
 0x13a   :  { %v626_v31 = vpop.f32.mrf.mxu0  ;;  %v863_v27 = vadd.f32 %v2422_v9, %v3625_v17  ;;  %2588 = vtanh.f32 %v860_v20  ;;  %v3689_v24 = vpop.eup %2566 }
 0x13b   :  { %v854_v29 = vpop.f32.mrf.mxu1  ;;  %2590 = vtanh.f32 %v625_v61  ;;  %v3693_v17 = vpop.eup %2568 }
 0x13c   :  { %v628_v51 = vpop.f32.mrf.mxu0  ;;  %2592 = vtanh.f32 %v863_v27  ;;  %v3695_v20 = vpop.eup %2570 }
 0x13d   :  { %v629_v2 = vadd.f32 %v628_v51, %v3505_v46  ;;  %v2425_v28 = vpop.f32.mrf.mxu1  ;;  %4603 = vst [vmem:[#allocation32_spill] sm:$0xff] %v3695_v20  ;;  %v3699_v6 = vpop.eup %2572 }
 0x13e   :  { %v632_v47 = vpop.f32.mrf.mxu0  ;;  %v876_v53 = vadd.f32 %v2425_v28, %v3539_v4  ;;  %v3703_v28 = vpop.permute.xlu1 %264 }
 0x13f   :  { %v633_v9 = vadd.f32 %v632_v47, %v3499_v43  ;;  %2594 = vtanh.f32 %v629_v2  ;;  %v867_v21 = vpop.f32.mrf.mxu1  ;;  %v3701_v47 = vpop.eup %2574 }
 0x140   :  { %v634_v37 = vpop.f32.mrf.mxu0  ;;  %v868_v61 = vadd.f32 %v867_v21, %v3550_v16  ;;  %v3707_v19 = vpop.eup %2576 }
 0x141   :  { %2596 = vtanh.f32 %v633_v9  ;;  %v635_v51 = vadd.f32 %v634_v37, %v3499_v43  ;;  %v2426_v22 = vpop.f32.mrf.mxu1  ;;  %v3709_v21 = vpop.eup %2578  ;;  %v852_v9 = vadd.f32 %v851_v11, %v3578_v52 }
 0x142   :  { %2598 = vtanh.f32 %v876_v53  ;;  %v636_v27 = vpop.f32.mrf.mxu0  ;;  %v879_v4 = vadd.f32 %v2426_v22, %v3584_v63  ;;  %v3714_v20 = vpop.eup %2580  ;;  %v855_v63 = vadd.f32 %v854_v29, %v3641_v39 }
 0x143   :  { %2600 = vtanh.f32 %v635_v51  ;;  %v637_v2 = vadd.f32 %v636_v27, %v3503_v45  ;;  %v870_v37 = vpop.f32.mrf.mxu1  ;;  %v627_v51 = vadd.f32 %v626_v31, %v3505_v46  ;;  %v3717_v27 = vpop.eup %2582 }
 0x144   :  { %2602 = vtanh.f32 %v868_v61  ;;  %v638_v43 = vpop.f32.mrf.mxu0  ;;  %v871_v16 = vadd.f32 %v870_v37, %v3607_v23  ;;  %v3719_v61 = vpop.permute.xlu0 %249  ;;  %v839_v23 = vadd.f32 %v3655_v49, %v3684_v5  ;;  %v1033_v49 = vpack.c.bf16 %v3682_v18, %v3671_v42 }
 0x145   :  { %2604 = vtanh.f32 %v637_v2  ;;  %v639_v53 = vadd.f32 %v638_v43, %v3503_v45  ;;  %v3722_v3 = vpop.eup %2584  ;;  %v255_v46 = vpop.permute.xlu1 %254 }
 0x146   :  { %2606 = vtanh.f32 %v879_v4  ;;  %v642_v22 = vpop.f32.mrf.mxu0  ;;  %v3725_v2 = vpop.eup %2586 }
 0x147   :  { %2608 = vtanh.f32 %v639_v53  ;;  %v643_v45 = vadd.f32 %v642_v22, %v3719_v61  ;;  %v3727_v43 = vpop.eup %2588 }
 0x148   :  { %2610 = vtanh.f32 %v871_v16  ;;  %v644_v11 = vpop.f32.mrf.mxu0  ;;  %v3730_v37 = vpop.eup %2590  ;;  %v847_v16 = vadd.f32 %v3647_v26, %v3665_v38 }
 0x149   :  { %2612 = vtanh.f32 %v852_v9  ;;  %v645_v4 = vadd.f32 %v644_v11, %v3719_v61  ;;  %v3732_v53 = vpop.eup %2592  ;;  %v607_v9 = vadd.f32 %v3621_v10, %v3513_v50  ;;  %v836_v11 = vadd.f32 %v3637_v12, %v3617_v8 }
 0x14a   :  { %2614 = vtanh.f32 %v627_v51  ;;  %v646_v31 = vpop.f32.mrf.mxu0 }
 0x14b   :  { %2616 = vtanh.f32 %v855_v63  ;;  %v647_v29 = vadd.f32 %v646_v31, %v255_v46 }
 0x14c   :  { %2618 = vtanh.f32 %v643_v45  ;;  %v648_v22 = vpop.f32.mrf.mxu0  ;;  %v2595_v52 = vpop.eup %2594 }
 0x14d   :  { %2620 = vtanh.f32 %v647_v29  ;;  %v649_v51 = vadd.f32 %v648_v22, %v255_v46 }
 0x14e   :  { %v2597_v39 = vpop.eup %2596  ;;  %2622 = vtanh.f32 %v645_v4  ;;  %v652_v63 = vpop.f32.mrf.mxu0 }
 0x14f   :  { %v2599_v31 = vpop.eup %2598  ;;  %2624 = vtanh.f32 %v649_v51  ;;  %v653_v45 = vadd.f32 %v652_v63, %v3633_v25 }
 0x150   :  { %v2601_v26 = vpop.eup %2600  ;;  %2626 = vtanh.f32 %v847_v16  ;;  %v654_v38 = vpop.f32.mrf.mxu0  ;;  %v831_v16 = vadd.f32 %v3623_v41, %v3703_v28 }
 0x151   :  { %v2603_v1 = vpop.eup %2602  ;;  %2628 = vtanh.f32 %v607_v9  ;;  %v655_v10 = vadd.f32 %v654_v38, %v3633_v25 }
 0x152   :  { %v2605_v50 = vpop.eup %2604  ;;  %2630 = vtanh.f32 %v836_v11  ;;  %v656_v29 = vpop.f32.mrf.mxu0  ;;  %v585_v11 = vadd.f32 %v3562_v30, %v3522_v54  ;;  %v1029_v54 = vpack.c.bf16 %v2595_v52, %v3730_v37  ;;  %v1030_v30 = vpack.c.bf16 %v3689_v24, %v3677_v48 }
 0x153   :  { %v2607_v12 = vpop.eup %2606  ;;  %2632 = vtanh.f32 %v839_v23  ;;  %v657_v4 = vadd.f32 %v656_v29, %v3703_v28  ;;  %v587_v29 = vadd.f32 %v3568_v34, %v3524_v55  ;;  %v1031_v18 = vpack.c.bf16 %v2605_v50, %v2597_v39 }
 0x154   :  { %v2609_v22 = vpop.eup %2608  ;;  %2634 = vtanh.f32 %v653_v45  ;;  %v658_v51 = vpop.f32.mrf.mxu0  ;;  %v1057_v63 = vpack.c.bf16 %v2607_v12, %v2599_v31  ;;  %v820_v31 = vadd.f32 %v3615_v36, %v3719_v61  ;;  %v823_v55 = vadd.f32 %v3629_v35, %v255_v46 }
 0x155   :  { %v2611_v9 = vpop.eup %2610  ;;  %2636 = vtanh.f32 %v657_v4  ;;  %v659_v25 = vadd.f32 %v658_v51, %v3703_v28  ;;  %v1032_v23 = vpack.c.bf16 %v2609_v22, %v2601_v26  ;;  %v575_v39 = vadd.f32 %v3548_v14, %v3526_v56 }
 0x156   :  { %v2613_v38 = vpop.eup %2612  ;;  %2638 = vtanh.f32 %v655_v10  ;;  %2245 = vmatprep.subr.bf16.mxu0 %v1057_v63  ;;  %v3754_v42 = vpop.f32.mrf.mxu0  ;;  %v1054_v41 = vpack.c.bf16 %v2611_v9, %v2603_v1  ;;  %v1051_v1 = vpack.c.bf16 %v3732_v53, %v3727_v43  ;;  %v569_v48 = vadd.f32 %v3543_v7, %v3536_v0  ;;  %v4604_v63 = vld [vmem:[#allocation20_spill] sm:$0xff] }
 0x157   :  { %v2615_v45 = vpop.eup %2614  ;;  %2640 = vtanh.f32 %v659_v25  ;;  %2246 = vmatpush3.bf16.msra.mxu0 %v1033_v49  ;;  %1410 = vmatprep.subr.bf16.mxu1 %v1032_v23  ;;  %v1026_v43 = vpack.c.bf16 %v3722_v3, %v3714_v20  ;;  %v1027_v56 = vpack.c.bf16 %v3657_v60, %v3649_v58  ;;  %v565_v37 = vadd.f32 %v3534_v62, %v3530_v57 }
 0x158   :  { %v2617_v28 = vpop.eup %2616  ;;  %2642 = vtanh.f32 %v831_v16  ;;  %2247 = vmatprep.subr.bf16.mxu0 %v1054_v41  ;;  %v3762_v34 = vpop.f32.mrf.mxu0  ;;  %1411 = vmatpush1.bf16.msra.mxu1 %v1031_v18  ;;  %v1028_v24 = vpack.c.bf16 %v2615_v45, %v3725_v2  ;;  %v1025_v20 = vpack.c.bf16 %v3717_v27, %v3707_v19  ;;  %v1023_v26 = vpack.c.bf16 %v3701_v47, %v3699_v6 }
 0x159   :  { %v3766_v36 = vpop.eup %2618  ;;  %2644 = vtanh.f32 %v585_v11  ;;  %1412 = vmatprep.subr.bf16.mxu1 %v1029_v54  ;;  %v1048_v7 = vpack.c.bf16 %v2617_v28, %v2613_v38  ;;  %v1024_v57 = vpack.c.bf16 %v3663_v32, %v3652_v59  ;;  %v1020_v32 = vpack.c.bf16 %v3687_v44, %v3674_v40  ;;  %v4606_v11 = vld [vmem:[#allocation30_spill] sm:$0xff]  ;;  %v4609_v54 = vld [vmem:[#allocation24_spill] sm:$0xff]  ;;  %v4612_v28 = vld [vmem:[#allocation27_spill] sm:$0xff] }
 0x15a   :  { %v3770_v52 = vpop.eup %2620  ;;  %2646 = vtanh.f32 %v587_v29  ;;  %v3774_v35 = vpop.f32.mrf.mxu0  ;;  %v1019_v40 = vpack.c.bf16 %v3680_v33, %v3668_v15  ;;  %v4605_v9 = vpack.c.bf16 %v3595_v13, %v4604_v63  ;;  %v4607_v29 = vld [vmem:[#allocation32_spill] sm:$0xff]  ;;  %v4608_v15 = vld [vmem:[#allocation29_spill] sm:$0xff] }
 0x15b   :  { %v3777_v61 = vpop.eup %2622  ;;  %2648 = vtanh.f32 %v820_v31  ;;  %2248 = vmatpush3.bf16.msra.mxu0 %v1030_v30  ;;  %v1034_v14 = vpack.c.bf16 %v3770_v52, %v3766_v36  ;;  %v4610_v30 = vld [vmem:[#allocation21_spill] sm:$0xff]  ;;  %v2496_v36 = vld [vmem:[%s4516_s3 + $0xa0] ss:$8 sps:$4 sm:$0xff]  }
 0x15c   :  { %v3785_v46 = vpop.eup %2624  ;;  %2650 = vtanh.f32 %v823_v55  ;;  %2249 = vmatprep.subr.bf16.mxu0 %v1051_v1  ;;  %v3787_v0 = vpop.f32.mrf.mxu0  ;;  %1413 = vmatpush1.bf16.msra.mxu1 %v1028_v24  ;;  %v4611_v13 = vpack.c.bf16 %v4609_v54, %v4610_v30  ;;  %v2497_v52 = vld [vmem:[%s4516_s3 + $0xb4] ss:$8 sps:$4 sm:$0xff]  }
 0x15d   :  { %v2627_v2 = vpop.eup %2626  ;;  %2652 = vtanh.f32 %v575_v39  ;;  %1414 = vmatprep.subr.bf16.mxu1 %v1026_v43  ;;  %v1035_v58 = vpack.c.bf16 %v3785_v46, %v3777_v61  ;;  %v2493_v61 = vld [vmem:[%s4516_s3 + $0x90] ss:$8 sps:$4 sm:$0xff]   ;;  %v2494_v46 = vld [vmem:[%s4516_s3 + $0xa4] ss:$8 sps:$4 sm:$0xff]  }
 0x15e   :  { %v2629_v60 = vpop.eup %2628  ;;  %v3793_v3 = vpop.f32.mrf.mxu0  ;;  %2654 = vtanh.f32 %v569_v48  ;;  %v1045_v10 = vpack.c.bf16 %v2627_v2, %v3709_v21 }
 0x15f   :  { %v2631_v53 = vpop.eup %2630  ;;  %2250 = vmatpush3.bf16.msra.mxu0 %v1027_v56  ;;  %2656 = vtanh.f32 %v565_v37  ;;  %v1022_v6 = vpack.c.bf16 %v2629_v60, %v3693_v17  ;;  %v4613_v56 = vld [vmem:[#allocation15_spill] sm:$0xff] }
 0x160   :  { %v2633_v62 = vpop.eup %2632  ;;  %2251 = vmatprep.subr.bf16.mxu0 %v1048_v7  ;;  %v3801_v50 = vpop.f32.mrf.mxu0  ;;  %1415 = vmatpush1.bf16.msra.mxu1 %v1025_v20  ;;  %v4614_v7 = vld [vmem:[#allocation12_spill] sm:$0xff]  ;;  %v4616_v20 = vld [vmem:[#allocation22_spill] sm:$0xff] }
 0x161   :  { %v3804_v12 = vpop.eup %2634  ;;  %1416 = vmatprep.subr.bf16.mxu1 %v1023_v26  ;;  %v1042_v49 = vpack.c.bf16 %v2633_v62, %v2631_v53  ;;  %v4615_v2 = vpack.c.bf16 %v4613_v56, %v4614_v7  ;;  %v4617_v53 = vld [vmem:[#allocation18_spill] sm:$0xff]  ;;  %v4628_v56 = vld [vmem:[#allocation9_spill] sm:$0xff] }
 0x162   :  { %v3806_v19 = vpop.eup %2636  ;;  %v3808_v27 = vpop.f32.mrf.mxu0  ;;  %v4618_v26 = vpack.c.bf16 %v4616_v20, %v4617_v53  ;;  %v3850_v62 = vld [vmem:[%s4516_s3] ss:$8 sps:$4 sm:$0xff]  }
 0x163   :  { %v3811_v47 = vpop.eup %2638  ;;  %2252 = vmatpush3.bf16.msra.mxu0 %v1024_v57  ;;  %v1037_v59 = vpack.c.bf16 %v3806_v19, %v3804_v12  ;;  %v4629_v20 = vld [vmem:[#allocation26_spill] sm:$0xff]  ;;  %v2505_v19 = vld [vmem:[%s4516_s3 + $0xd4] ss:$8 sps:$4 sm:$0xff]  }
 0x164   :  { %v3817_v21 = vpop.eup %2640  ;;  %2253 = vmatprep.subr.bf16.mxu0 %v1045_v10  ;;  %v3819_v4 = vpop.f32.mrf.mxu0  ;;  %1417 = vmatpush1.bf16.msra.mxu1 %v1022_v6  ;;  %v4619_v10 = vld [vmem:[#allocation16_spill] sm:$0xff]  ;;  %v4620_v6 = vld [vmem:[#allocation13_spill] sm:$0xff]  ;;  %v2500_v12 = vld [vmem:[%s4516_s3 + $0xc0] ss:$8 sps:$4 sm:$0xff]  }
 0x165   :  { %v2643_v22 = vpop.eup %2642  ;;  %1418 = vmatprep.subr.bf16.mxu1 %v1020_v32  ;;  %v1038_v17 = vpack.c.bf16 %v3817_v21, %v3811_v47  ;;  %v4621_v32 = vpack.c.bf16 %v4619_v10, %v4620_v6  ;;  %v4630_v10 = vld [vmem:[#allocation11_spill] sm:$0xff]  ;;  %v2503_v47 = vld [vmem:[%s4516_s3 + $0xd0] ss:$8 sps:$4 sm:$0xff]  }
 0x166   :  { %v2645_v16 = vpop.eup %2644  ;;  %v3823_v51 = vpop.f32.mrf.mxu0  ;;  %v1039_v41 = vpack.c.bf16 %v2643_v22, %v4607_v29  ;;  %v2506_v21 = vld [vmem:[%s4516_s3 + $0xe0] ss:$8 sps:$4 sm:$0xff]  }
 0x167   :  { %v2647_v44 = vpop.eup %2646  ;;  %2254 = vmatpush3.bf16.msra.mxu0 %v4605_v9  ;;  %v1017_v25 = vpack.c.bf16 %v4606_v11, %v2645_v16  ;;  %v4622_v16 = vld [vmem:[#allocation14_spill] sm:$0xff] }
 0x168   :  { %v2649_v23 = vpop.eup %2648  ;;  %2255 = vmatprep.subr.bf16.mxu0 %v1042_v49  ;;  %v3831_v38 = vpop.f32.mrf.mxu0  ;;  %1419 = vmatpush1.bf16.msra.mxu1 %v1019_v40  ;;  %v1016_v33 = vpack.c.bf16 %v2647_v44, %v4608_v15  ;;  %v3858_v49 = vld [vmem:[%s4516_s3 + $0x14] ss:$8 sps:$4 sm:$0xff]   ;;  %v4623_v40 = vld [vmem:[#allocation10_spill] sm:$0xff] }
 0x169   :  { %v2651_v18 = vpop.eup %2650  ;;  %1420 = vmatprep.subr.bf16.mxu1 %v1017_v25  ;;  %v4624_v44 = vpack.c.bf16 %v4622_v16, %v4623_v40  ;;  %v3868_v25 = vld [vmem:[%s4516_s3 + $0x10] ss:$8 sps:$4 sm:$0xff]  }
 0x16a   :  { %v2653_v45 = vpop.eup %2652  ;;  %v3834_v31 = vpop.f32.mrf.mxu0  ;;  %v1036_v48 = vpack.c.bf16 %v2651_v18, %v2649_v23  ;;  %v3873_v23 = vld [vmem:[%s4516_s3 + $0x24] ss:$8 sps:$4 sm:$0xff]   ;;  %v4625_v18 = vld [vmem:[#allocation25_spill] sm:$0xff]  ;;  %v4631_v40 = vld [vmem:[#allocation28_spill] sm:$0xff] }
 0x16b   :  { %2256 = vmatpush3.bf16.msra.mxu0 %v4611_v13  ;;  %v1014_v55 = vpack.c.bf16 %v4612_v28, %v2653_v45  ;;  %v2655_v1 = vpop.eup %2654  ;;  %v3882_v13 = vld [vmem:[%s4516_s3 + $0x20] ss:$8 sps:$4 sm:$0xff]   ;;  %v3903_v16 = vld [vmem:[%s4516_s3 + $0x30] ss:$8 sps:$4 sm:$0xff]  }
 0x16c   :  { %2257 = vmatprep.subr.bf16.mxu0 %v1039_v41  ;;  %v688_v39 = vpop.f32.mrf.mxu0  ;;  %1421 = vmatpush1.bf16.msra.mxu1 %v1016_v33  ;;  %v2657_v24 = vpop.eup %2656  ;;  %v4626_v33 = vld [vmem:[#allocation8_spill] sm:$0xff]  ;;  %v4627_v28 = vld [vmem:[#allocation19_spill] sm:$0xff] }
 0x16d   :  { %1422 = vmatprep.subr.bf16.mxu1 %v1014_v55  ;;  %v1011_v37 = vpack.c.bf16 %v2655_v1, %v2657_v24  ;;  %v3888_v1 = vld [vmem:[%s4516_s3 + $0x34] ss:$8 sps:$4 sm:$0xff]  }
 0x16e   :  { %v692_v43 = vpop.f32.mrf.mxu0 }
 0x16f   :  { %2258 = vmatpush3.bf16.msra.mxu0 %v4615_v2 }
 0x170   :  { %2259 = vmatprep.subr.bf16.mxu0 %v1036_v48  ;;  %v694_v60 = vpop.f32.mrf.mxu0  ;;  %1423 = vmatpush1.bf16.msra.mxu1 %v4618_v26 }
 0x171   :  { %1424 = vmatprep.subr.bf16.mxu1 %v1011_v37  ;;  %v695_v6 = vadd.f32 %v694_v60, %v4630_v10  ;;  %v4632_v60 = vld [vmem:[#allocation17_spill] sm:$0xff] }
 0x172   :  { %v696_v57 = vpop.f32.mrf.mxu0 }
 0x173   :  { %2260 = vmatpush3.bf16.msra.mxu0 %v4621_v32  ;;  %v697_v32 = vadd.f32 %v696_v57, %v4629_v20  ;;  %v685_v57 = vadd.f32 %v3831_v38, %v4632_v60 }
 0x174   :  { %v698_v22 = vpop.f32.mrf.mxu0  ;;  %1425 = vmatpush1.bf16.msra.mxu1 %v4624_v44  ;;  %v689_v44 = vadd.f32 %v688_v39, %v4631_v40  ;;  %v4633_v39 = vld [vmem:[#allocation31_spill] sm:$0xff] }
 0x175   :  { %v699_v53 = vadd.f32 %v698_v22, %v4629_v20  ;;  %v3909_v22 = vld [vmem:[%s4516_s3 + $0x44] ss:$8 sps:$4 sm:$0xff]  }
 0x176   :  { %1636 = vmatmul.mubr.bf16.vlgmr.msra.gmra.mxu0 %v3850_v62  ;;  %v702_v63 = vpop.f32.mrf.mxu0  ;;  %v3956_v20 = vld [vmem:[%s4516_s3 + $0x64] ss:$8 sps:$4 sm:$0xff]  }
 0x177   :  { %1643 = vmatprep.mubr.bf16.mxu0 %v3858_v49  ;;  %v703_v26 = vadd.f32 %v702_v63, %v4628_v56  ;;  %v693_v63 = vadd.f32 %v692_v43, %v4630_v10  ;;  %v683_v43 = vadd.f32 %v3823_v51, %v4632_v60  ;;  %v669_v51 = vadd.f32 %v3787_v0, %v3684_v5  ;;  %v3963_v60 = vld [vmem:[%s4516_s3 + $0x60] ss:$8 sps:$4 sm:$0xff]  }
 0x178   :  { %v704_v9 = vpop.f32.mrf.mxu0  ;;  %v667_v0 = vadd.f32 %v3774_v35, %v3684_v5 }
 0x179   :  { %v705_v7 = vadd.f32 %v704_v9, %v4628_v56  ;;  %v687_v9 = vadd.f32 %v3834_v31, %v4631_v40  ;;  %v677_v31 = vadd.f32 %v3808_v27, %v4633_v39 }
 0x17a   :  { %v706_v11 = vpop.f32.mrf.mxu0 }
 0x17b   :  { %v707_v37 = vadd.f32 %v706_v11, %v4625_v18  ;;  %v679_v11 = vadd.f32 %v3819_v4, %v4633_v39  ;;  %v3929_v4 = vld [vmem:[%s4516_s3 + $0x40] ss:$8 sps:$4 sm:$0xff]   ;;  %v3968_v39 = vld [vmem:[%s4516_s3 + $0x74] ss:$8 sps:$4 sm:$0xff]  }
 0x17c   :  { %v708_v29 = vpop.f32.mrf.mxu0 }
 0x17d   :  { %v709_v45 = vadd.f32 %v708_v29, %v4625_v18 }
 0x17e   :  { %1644 = vmatmul.mubr.bf16.gmra.mxu0 %v3868_v25  ;;  %v712_v41 = vpop.f32.mrf.mxu0 }
 0x17f   :  { %1651 = vmatprep.mubr.bf16.mxu0 %v3873_v23  ;;  %2658 = vtanh.f32 %v709_v45  ;;  %v713_v48 = vadd.f32 %v712_v41, %v4626_v33  ;;  %v4634_v41 = vld [vmem:[#allocation23_spill] sm:$0xff] }
 0x180   :  { %v714_v15 = vpop.f32.mrf.mxu0  ;;  %v675_v38 = vadd.f32 %v3801_v50, %v4634_v41  ;;  %v3936_v50 = vld [vmem:[%s4516_s3 + $0x54] ss:$8 sps:$4 sm:$0xff]   ;;  %v673_v27 = vadd.f32 %v3793_v3, %v4634_v41 }
 0x181   :  { %v715_v54 = vadd.f32 %v714_v15, %v4626_v33 }
 0x182   :  { %v716_v30 = vpop.f32.mrf.mxu0 }
 0x183   :  { %v717_v55 = vadd.f32 %v716_v30, %v4627_v28  ;;  %2660 = vtanh.f32 %v715_v54  ;;  %v665_v54 = vadd.f32 %v3762_v34, %v3617_v8  ;;  %v663_v34 = vadd.f32 %v3754_v42, %v3617_v8 }
 0x184   :  { %v718_v24 = vpop.f32.mrf.mxu0 }
 0x185   :  { %v719_v2 = vadd.f32 %v718_v24, %v4627_v28  ;;  %2662 = vtanh.f32 %v717_v55 }
 0x186   :  { %1652 = vmatmul.mubr.bf16.gmra.mxu0 %v3882_v13 }
 0x187   :  { %2664 = vtanh.f32 %v719_v2  ;;  %1659 = vmatprep.mubr.bf16.mxu0 %v3888_v1 }
 0x188   :  { %2666 = vtanh.f32 %v713_v48 }
 0x189   :  { %2668 = vtanh.f32 %v705_v7  ;;  %v3951_v7 = vld [vmem:[%s4516_s3 + $0x50] ss:$8 sps:$4 sm:$0xff]  }
 0x18a   :  { %2670 = vtanh.f32 %v707_v37 }
 0x18b   :  { %2672 = vtanh.f32 %v699_v53 }
 0x18c   :  { %2674 = vtanh.f32 %v703_v26  ;;  %v2659_v29 = vpop.eup %2658 }
 0x18d   :  { %2676 = vtanh.f32 %v695_v6 }
 0x18e   :  { %2678 = vtanh.f32 %v697_v32  ;;  %1660 = vmatmul.mubr.bf16.gmra.mxu0 %v3903_v16 }
 0x18f   :  { %2680 = vtanh.f32 %v689_v44  ;;  %1667 = vmatprep.mubr.bf16.mxu0 %v3909_v22 }
 0x190   :  { %2682 = vtanh.f32 %v693_v63  ;;  %v2661_v18 = vpop.eup %2660 }
 0x191   :  { %2684 = vtanh.f32 %v685_v57 }
 0x192   :  { %2686 = vtanh.f32 %v687_v9  ;;  %v2663_v45 = vpop.eup %2662 }
 0x193   :  { %2688 = vtanh.f32 %v679_v11 }
 0x194   :  { %v2665_v15 = vpop.eup %2664  ;;  %2690 = vtanh.f32 %v683_v43 }
 0x195   :  { %v2667_v33 = vpop.eup %2666  ;;  %2692 = vtanh.f32 %v675_v38  ;;  %v1056_v30 = vpack.c.bf16 %v2665_v15, %v2661_v18  ;;  %v2488_v15 = vld [vmem:[%s4516_s3 + $0x84] ss:$8 sps:$4 sm:$0xff]  }
 0x196   :  { %v2669_v28 = vpop.eup %2668  ;;  %2694 = vtanh.f32 %v677_v31  ;;  %1668 = vmatmul.mubr.bf16.gmra.mxu0 %v3929_v4  ;;  %v1055_v55 = vpack.c.bf16 %v2663_v45, %v2667_v33  ;;  %v2491_v33 = vld [vmem:[%s4516_s3 + $0x94] ss:$8 sps:$4 sm:$0xff]  }
 0x197   :  { %v2671_v48 = vpop.eup %2670  ;;  %2696 = vtanh.f32 %v669_v51  ;;  %1426 = vmatprep.subr.bf16.mxu1 %v1056_v30  ;;  %v1053_v24 = vpack.c.bf16 %v2659_v29, %v2669_v28  ;;  %1675 = vmatprep.mubr.bf16.mxu0 %v3936_v50  ;;  %v2487_v51 = vld [vmem:[%s4516_s3 + $0x70] ss:$8 sps:$4 sm:$0xff]  }
 0x198   :  { %v2673_v3 = vpop.eup %2672  ;;  %2698 = vtanh.f32 %v673_v27  ;;  %1427 = vmatpush2.bf16.msra.mxu1 %v1055_v55  ;;  %v2490_v27 = vld [vmem:[%s4516_s3 + $0x80] ss:$8 sps:$4 sm:$0xff]  }
 0x199   :  { %v2675_v56 = vpop.eup %2674  ;;  %2700 = vtanh.f32 %v665_v54  ;;  %1428 = vmatprep.subr.bf16.mxu1 %v1053_v24 }
 0x19a   :  { %v2677_v5 = vpop.eup %2676  ;;  %2702 = vtanh.f32 %v667_v0  ;;  %v1052_v35 = vpack.c.bf16 %v2671_v48, %v2675_v56 }
 0x19b   :  { %v2679_v2 = vpop.eup %2678  ;;  %v1050_v37 = vpack.c.bf16 %v2673_v3, %v2677_v5  ;;  %2704 = vtanh.f32 %v663_v34 }
 0x19c   :  { %v2681_v8 = vpop.eup %2680  ;;  %1429 = vmatpush2.bf16.msra.mxu1 %v1052_v35 }
 0x19d   :  { %v2683_v42 = vpop.eup %2682  ;;  %1430 = vmatprep.subr.bf16.mxu1 %v1050_v37 }
 0x19e   :  { %v2685_v53 = vpop.eup %2684  ;;  %1676 = vmatmul.mubr.bf16.gmra.mxu0 %v3951_v7  ;;  %v1049_v26 = vpack.c.bf16 %v2679_v2, %v2683_v42 }
 0x19f   :  { %v2687_v10 = vpop.eup %2686  ;;  %v1047_v6 = vpack.c.bf16 %v2681_v8, %v2685_v53  ;;  %1683 = vmatprep.mubr.bf16.mxu0 %v3956_v20 }
 0x1a0   :  { %v2689_v32 = vpop.eup %2688  ;;  %1431 = vmatpush2.bf16.msra.mxu1 %v1049_v26 }
 0x1a1   :  { %v2691_v40 = vpop.eup %2690  ;;  %1432 = vmatprep.subr.bf16.mxu1 %v1047_v6 }
 0x1a2   :  { %v2693_v44 = vpop.eup %2692  ;;  %v1046_v63 = vpack.c.bf16 %v2687_v10, %v2691_v40 }
 0x1a3   :  { %v2695_v57 = vpop.eup %2694  ;;  %v1044_v9 = vpack.c.bf16 %v2689_v32, %v2693_v44 }
 0x1a4   :  { %v2697_v11 = vpop.eup %2696  ;;  %1433 = vmatpush2.bf16.msra.mxu1 %v1046_v63 }
 0x1a5   :  { %v2699_v43 = vpop.eup %2698  ;;  %1434 = vmatprep.subr.bf16.mxu1 %v1044_v9 }
 0x1a6   :  { %v2701_v29 = vpop.eup %2700  ;;  %1684 = vmatmul.mubr.bf16.gmra.mxu0 %v3963_v60  ;;  %v1043_v41 = vpack.c.bf16 %v2695_v57, %v2699_v43 }
 0x1a7   :  { %v2703_v38 = vpop.eup %2702  ;;  %v1041_v18 = vpack.c.bf16 %v2697_v11, %v2701_v29  ;;  %1691 = vmatprep.mubr.bf16.mxu0 %v3968_v39 }
 0x1a8   :  { %1435 = vmatpush2.bf16.msra.mxu1 %v1043_v41  ;;  %v2705_v31 = vpop.eup %2704 }
 0x1a9   :  { %1436 = vmatprep.subr.bf16.mxu1 %v1041_v18  ;;  %v1040_v45 = vpack.c.bf16 %v2703_v38, %v2705_v31 }
 0x1ac   :  { %1437 = vmatpush2.bf16.msra.mxu1 %v1040_v45 }
 0x1ad   :  { %1438 = vmatprep.subr.bf16.mxu1 %v1038_v17  ;;  %v2511_v17 = vld [vmem:[%s4516_s3 + $0xf4] ss:$8 sps:$4 sm:$0xff]  }
 0x1ae   :  { %1692 = vmatmul.mubr.bf16.gmra.mxu0 %v2487_v51 }
 0x1af   :  { %1699 = vmatprep.mubr.bf16.mxu0 %v2488_v15 }
 0x1b0   :  { %1439 = vmatpush2.bf16.msra.mxu1 %v1037_v59  ;;  %v2508_v59 = vld [vmem:[%s4516_s3 + $0xe4] ss:$8 sps:$4 sm:$0xff]  }
 0x1b1   :  { %1440 = vmatprep.subr.bf16.mxu1 %v1035_v58  ;;  %v2502_v58 = vld [vmem:[%s4516_s3 + $0xc4] ss:$8 sps:$4 sm:$0xff]  }
 0x1b4   :  { %1441 = vmatpush2.bf16.msra.mxu1 %v1034_v14  ;;  %v2499_v14 = vld [vmem:[%s4516_s3 + $0xb0] ss:$8 sps:$4 sm:$0xff]  }
 0x1b6   :  { %1700 = vmatmul.mubr.bf16.gmra.mxu0 %v2490_v27 }
 0x1b7   :  { %1443 = vmatmul.mubr.bf16.vlgmr.msra.gmra.mxu1 %v3850_v62  ;;  %1707 = vmatprep.mubr.bf16.mxu0 %v2491_v33  ;;  %v2509_v62 = vld [vmem:[%s4516_s3 + $0xf0] ss:$8 sps:$4 sm:$0xff]  }
 0x1b8   :  { %1452 = vmatprep.mubr.bf16.mxu1 %v3858_v49  ;;  %v4049_v49 = vpop.permute.xlu0 %1162 }
 0x1be   :  { %1708 = vmatmul.mubr.bf16.gmra.mxu0 %v2493_v61 }
 0x1bf   :  { %1453 = vmatmul.mubr.bf16.gmra.mxu1 %v3868_v25  ;;  %1715 = vmatprep.mubr.bf16.mxu0 %v2494_v46  ;;  %v4051_v25 = vpop.permute.xlu1 %1167 }
 0x1c0   :  { %1462 = vmatprep.mubr.bf16.mxu1 %v3873_v23  ;;  %v4053_v23 = vpop.permute.xlu0 %1152 }
 0x1c6   :  { %1716 = vmatmul.mubr.bf16.gmra.mxu0 %v2496_v36 }
 0x1c7   :  { %1463 = vmatmul.mubr.bf16.gmra.mxu1 %v3882_v13  ;;  %1723 = vmatprep.mubr.bf16.mxu0 %v2497_v52  ;;  %v4055_v13 = vpop.permute.xlu1 %1157 }
 0x1c8   :  { %1472 = vmatprep.mubr.bf16.mxu1 %v3888_v1  ;;  %v4057_v1 = vpop.permute.xlu0 %1142 }
 0x1ce   :  { %1724 = vmatmul.mubr.bf16.gmra.mxu0 %v2499_v14 }
 0x1cf   :  { %1473 = vmatmul.mubr.bf16.gmra.mxu1 %v3903_v16  ;;  %1731 = vmatprep.mubr.bf16.mxu0 %v2502_v58  ;;  %v4059_v16 = vpop.permute.xlu1 %1147 }
 0x1d0   :  { %1482 = vmatprep.mubr.bf16.mxu1 %v3909_v22  ;;  %v4061_v22 = vpop.permute.xlu0 %1132 }
 0x1d6   :  { %1732 = vmatmul.mubr.bf16.gmra.mxu0 %v2500_v12 }
 0x1d7   :  { %1483 = vmatmul.mubr.bf16.gmra.mxu1 %v3929_v4  ;;  %1739 = vmatprep.mubr.bf16.mxu0 %v2505_v19  ;;  %v4063_v4 = vpop.permute.xlu1 %1137 }
 0x1d8   :  { %1492 = vmatprep.mubr.bf16.mxu1 %v3936_v50  ;;  %v4065_v50 = vpop.permute.xlu0 %1122 }
 0x1db   :  { %v4067_v54 = vpop.permute.xlu1 %1127 }
 0x1dc   :  { %v4069_v30 = vpop.permute.xlu0 %1112 }
 0x1de   :  { %1740 = vmatmul.mubr.bf16.gmra.mxu0 %v2503_v47 }
 0x1df   :  { %1493 = vmatmul.mubr.bf16.gmra.mxu1 %v3951_v7  ;;  %1747 = vmatprep.mubr.bf16.mxu0 %v2508_v59  ;;  %v4071_v28 = vpop.permute.xlu1 %1117 }
 0x1e0   :  { %1502 = vmatprep.mubr.bf16.mxu1 %v3956_v20  ;;  %v4073_v0 = vpop.permute.xlu0 %1102 }
 0x1e3   :  { %v4075_v48 = vpop.permute.xlu1 %1107 }
 0x1e4   :  { %v4077_v56 = vpop.permute.xlu0 %1092 }
 0x1e6   :  { %1748 = vmatmul.mubr.bf16.gmra.mxu0 %v2506_v21 }
 0x1e7   :  { %1503 = vmatmul.mubr.bf16.gmra.mxu1 %v3963_v60  ;;  %1755 = vmatprep.mubr.bf16.mxu0 %v2511_v17  ;;  %v4080_v2 = vpop.permute.xlu1 %1097 }
 0x1e8   :  { %1512 = vmatprep.mubr.bf16.mxu1 %v3968_v39  ;;  %v4093_v18 = vpop.permute.xlu0 %1242 }
 0x1ee   :  { %1756 = vmatmul.mubr.bf16.gmra.mxu0 %v2509_v62 }
 0x1ef   :  { %1513 = vmatmul.mubr.bf16.gmra.mxu1 %v2487_v51 }
 0x1f0   :  { %1522 = vmatprep.mubr.bf16.mxu1 %v2488_v15  ;;  %v4095_v15 = vpop.permute.xlu1 %1247 }
 0x1f7   :  { %1523 = vmatmul.mubr.bf16.gmra.mxu1 %v2490_v27 }
 0x1f8   :  { %1532 = vmatprep.mubr.bf16.mxu1 %v2491_v33 }
 0x1ff   :  { %1533 = vmatmul.mubr.bf16.gmra.mxu1 %v2493_v61 }
 0x200   :  { %1542 = vmatprep.mubr.bf16.mxu1 %v2494_v46 }
 0x207   :  { %1543 = vmatmul.mubr.bf16.gmra.mxu1 %v2496_v36 }
 0x208   :  { %1552 = vmatprep.mubr.bf16.mxu1 %v2497_v52  ;;  %v4102_v52 = vpop.permute.xlu0 %1232 }
 0x20f   :  { %1553 = vmatmul.mubr.bf16.gmra.mxu1 %v2499_v14 }
 0x210   :  { %1562 = vmatprep.mubr.bf16.mxu1 %v2502_v58 }
 0x217   :  { %1563 = vmatmul.mubr.bf16.gmra.mxu1 %v2500_v12 }
 0x218   :  { %1572 = vmatprep.mubr.bf16.mxu1 %v2505_v19 }
 0x21f   :  { %1573 = vmatmul.mubr.bf16.gmra.mxu1 %v2503_v47 }
 0x220   :  { %1582 = vmatprep.mubr.bf16.mxu1 %v2508_v59  ;;  %v4107_v59 = vpop.permute.xlu1 %1237 }
 0x227   :  { %1583 = vmatmul.mubr.bf16.gmra.mxu1 %v2506_v21 }
 0x228   :  { %1592 = vmatprep.mubr.bf16.mxu1 %v2511_v17  ;;  %v4109_v17 = vpop.permute.xlu0 %1222 }
 0x22f   :  { %1593 = vmatmul.mubr.bf16.gmra.mxu1 %v2509_v62 }
 0x236   :  { %v2261_v55 = vpop.f32.mrf.mxu0 }
 0x238   :  { %v2262_v24 = vpop.f32.mrf.mxu0 }
 0x239   :  { %v2263_v3 = vadd.f32 %v2262_v24, %v2261_v55 }
 0x23a   :  { %v2264_v34 = vpop.f32.mrf.mxu0 }
 0x23b   :  { %v1638_v5 = vadd.f32 %v2263_v3, %v4077_v56 }
 0x23c   :  { %v2265_v35 = vpop.f32.mrf.mxu0 }
 0x23d   :  { %v2266_v7 = vadd.f32 %v2265_v35, %v2264_v34  ;;  %2706 = vtanh.f32 %v1638_v5 }
 0x23e   :  { %v2267_v37 = vpop.f32.mrf.mxu0 }
 0x23f   :  { %v1641_v20 = vadd.f32 %v2266_v7, %v4080_v2 }
 0x240   :  { %v2268_v8 = vpop.f32.mrf.mxu0 }
 0x241   :  { %2708 = vtanh.f32 %v1641_v20  ;;  %v2269_v42 = vadd.f32 %v2268_v8, %v2267_v37  ;;  %v4119_v37 = vpop.permute.xlu1 %1227 }
 0x242   :  { %v2270_v53 = vpop.f32.mrf.mxu0 }
 0x243   :  { %v1646_v26 = vadd.f32 %v2269_v42, %v4073_v0  ;;  %v4121_v42 = vpop.permute.xlu0 %1212 }
 0x244   :  { %v2271_v10 = vpop.f32.mrf.mxu0 }
 0x245   :  { %v2272_v6 = vadd.f32 %v2271_v10, %v2270_v53  ;;  %2710 = vtanh.f32 %v1646_v26 }
 0x246   :  { %v2273_v32 = vpop.f32.mrf.mxu0 }
 0x247   :  { %v1649_v40 = vadd.f32 %v2272_v6, %v4075_v48 }
 0x248   :  { %v2274_v44 = vpop.f32.mrf.mxu0 }
 0x249   :  { %2712 = vtanh.f32 %v1649_v40  ;;  %v2275_v63 = vadd.f32 %v2274_v44, %v2273_v32  ;;  %v4128_v44 = vpop.permute.xlu1 %1217 }
 0x24a   :  { %v2276_v60 = vpop.f32.mrf.mxu0  ;;  %v4086_v39 = vpop.eup %2706 }
 0x24b   :  { %v1654_v57 = vadd.f32 %v2275_v63, %v4069_v30  ;;  %4635 = vst [vmem:[#allocation20_spill] sm:$0xff] %v4086_v39 }
 0x24c   :  { %v2277_v9 = vpop.f32.mrf.mxu0 }
 0x24d   :  { %v2278_v11 = vadd.f32 %v2277_v9, %v2276_v60  ;;  %2714 = vtanh.f32 %v1654_v57  ;;  %v4133_v9 = vpop.permute.xlu0 %1202 }
 0x24e   :  { %v4088_v43 = vpop.eup %2708  ;;  %v2279_v29 = vpop.f32.mrf.mxu0 }
 0x24f   :  { %4636 = vst [vmem:[#allocation30_spill] sm:$0xff] %v4088_v43  ;;  %v1657_v41 = vadd.f32 %v2278_v11, %v4071_v28 }
 0x250   :  { %v2280_v31 = vpop.f32.mrf.mxu0 }
 0x251   :  { %2716 = vtanh.f32 %v1657_v41  ;;  %v2281_v45 = vadd.f32 %v2280_v31, %v2279_v29  ;;  %v4135_v31 = vpop.permute.xlu1 %1207 }
 0x252   :  { %v2282_v51 = vpop.f32.mrf.mxu0  ;;  %v4098_v61 = vpop.eup %2710 }
 0x253   :  { %v1662_v27 = vadd.f32 %v2281_v45, %v4065_v50  ;;  %4637 = vst [vmem:[#allocation32_spill] sm:$0xff] %v4098_v61 }
 0x254   :  { %v2283_v33 = vpop.f32.mrf.mxu0 }
 0x255   :  { %v2284_v46 = vadd.f32 %v2283_v33, %v2282_v51  ;;  %2718 = vtanh.f32 %v1662_v27 }
 0x256   :  { %v4100_v36 = vpop.eup %2712  ;;  %v2285_v14 = vpop.f32.mrf.mxu0 }
 0x257   :  { %4638 = vst [vmem:[#allocation29_spill] sm:$0xff] %v4100_v36  ;;  %v1665_v58 = vadd.f32 %v2284_v46, %v4067_v54 }
 0x258   :  { %v2286_v19 = vpop.f32.mrf.mxu0 }
 0x259   :  { %2720 = vtanh.f32 %v1665_v58  ;;  %v2287_v47 = vadd.f32 %v2286_v19, %v2285_v14  ;;  %v4142_v14 = vpop.permute.xlu0 %1192 }
 0x25a   :  { %v2288_v21 = vpop.f32.mrf.mxu0  ;;  %v4112_v24 = vpop.eup %2714 }
 0x25b   :  { %v1670_v62 = vadd.f32 %v2287_v47, %v4061_v22  ;;  %4639 = vst [vmem:[#allocation24_spill] sm:$0xff] %v4112_v24 }
 0x25c   :  { %v2289_v55 = vpop.f32.mrf.mxu0 }
 0x25d   :  { %v2290_v3 = vadd.f32 %v2289_v55, %v2288_v21  ;;  %2722 = vtanh.f32 %v1670_v62  ;;  %v4147_v55 = vpop.permute.xlu1 %1197 }
 0x25e   :  { %v4114_v34 = vpop.eup %2716  ;;  %v2291_v5 = vpop.f32.mrf.mxu0 }
 0x25f   :  { %4640 = vst [vmem:[#allocation21_spill] sm:$0xff] %v4114_v34  ;;  %v1673_v35 = vadd.f32 %v2290_v3, %v4063_v4 }
 0x260   :  { %v2292_v20 = vpop.f32.mrf.mxu0 }
 0x261   :  { %2724 = vtanh.f32 %v1673_v35  ;;  %v2293_v8 = vadd.f32 %v2292_v20, %v2291_v5  ;;  %v4149_v5 = vpop.permute.xlu0 %1182 }
 0x262   :  { %v2294_v53 = vpop.f32.mrf.mxu0  ;;  %v4124_v6 = vpop.eup %2718 }
 0x263   :  { %v1678_v26 = vadd.f32 %v2293_v8, %v4057_v1  ;;  %4641 = vst [vmem:[#allocation27_spill] sm:$0xff] %v4124_v6 }
 0x264   :  { %v2295_v10 = vpop.f32.mrf.mxu0 }
 0x265   :  { %v2296_v32 = vadd.f32 %v2295_v10, %v2294_v53  ;;  %2726 = vtanh.f32 %v1678_v26 }
 0x266   :  { %v4126_v40 = vpop.eup %2720  ;;  %v2297_v63 = vpop.f32.mrf.mxu0 }
 0x267   :  { %4642 = vst [vmem:[#allocation15_spill] sm:$0xff] %v4126_v40  ;;  %v1681_v60 = vadd.f32 %v2296_v32, %v4059_v16 }
 0x268   :  { %v2298_v11 = vpop.f32.mrf.mxu0 }
 0x269   :  { %2728 = vtanh.f32 %v1681_v60  ;;  %v2299_v29 = vadd.f32 %v2298_v11, %v2297_v63  ;;  %v4159_v11 = vpop.permute.xlu1 %1187 }
 0x26a   :  { %v2300_v41 = vpop.f32.mrf.mxu0  ;;  %v4138_v27 = vpop.eup %2722 }
 0x26b   :  { %v1686_v45 = vadd.f32 %v2299_v29, %v4053_v23  ;;  %4643 = vst [vmem:[#allocation12_spill] sm:$0xff] %v4138_v27 }
 0x26c   :  { %v2301_v51 = vpop.f32.mrf.mxu0 }
 0x26d   :  { %v2302_v33 = vadd.f32 %v2301_v51, %v2300_v41  ;;  %2730 = vtanh.f32 %v1686_v45 }
 0x26e   :  { %v4140_v46 = vpop.eup %2724  ;;  %v2303_v58 = vpop.f32.mrf.mxu0 }
 0x26f   :  { %4644 = vst [vmem:[#allocation22_spill] sm:$0xff] %v4140_v46  ;;  %v1689_v19 = vadd.f32 %v2302_v33, %v4055_v13  ;;  %v4162_v33 = vpop.permute.xlu0 %1172  ;;  %v4244_v46 = vld [vmem:[%s4518_s5] sm:$0xff]  ;;  %s2955_s5 = smov [#allocation2]  }
 0x270   :  { %v2304_v21 = vpop.f32.mrf.mxu0  ;;  %4656 = vst [vmem:[#allocation28_spill] sm:$0xff] %v4244_v46  ;;  %s2069_s18 = sshll.u32 %s2955_s5, 4  ;;  %s2070_s18 = int_to_ptr.vmem [resolvable:$true] %s2069_s18 }
 0x271   :  { %2732 = vtanh.f32 %v1689_v19  ;;  %v2305_v62 = vadd.f32 %v2304_v21, %v2303_v58  ;;  %s2910_s19 = scalar_lea.vmem %s2070_s18, 384  ;;  %p2915_p1 = scmp.lt.s32.totalorder %s2070_s18, %s2070_s18 }
 0x272   :  { %v2306_v3 = vpop.f32.mrf.mxu0  ;;  %v4152_v8 = vpop.eup %2726  ;;  %p2911_p0 = scmp.ne.s32.totalorder %s2070_s18, %s2910_s19  ;;  %p2916_p2 = scmp.lt.s32.totalorder %s2910_s19, %s2910_s19 }
 0x273   :  { %v1694_v35 = vadd.f32 %v2305_v62, %v4049_v49  ;;  %4645 = vst [vmem:[#allocation18_spill] sm:$0xff] %v4152_v8  ;;  %v4248_v8 = vcombine.high %v4244_v46, %v4244_v46 }
 0x274   :  { %v2307_v20 = vpop.f32.mrf.mxu0  ;;  %p2917_p3 = por %p2916_p2, %p2915_p1 }
 0x275   :  { %v2308_v53 = vadd.f32 %v2307_v20, %v2306_v3  ;;  %2734 = vtanh.f32 %v1694_v35  ;;  %4657 = vst [vmem:[#allocation17_spill] sm:$0xff] %v4248_v8  ;;  %1954 = vmatprep.mubr.bf16.mxu1 %v4248_v8 }
 0x276   :  { %v4154_v26 = vpop.eup %2728  ;;  %v2309_v10 = vpop.f32.mrf.mxu0  ;;  %p2918_p4 = pnand %p2917_p3, %p2911_p0 }
 0x277   :  { %4646 = vst [vmem:[#allocation16_spill] sm:$0xff] %v4154_v26  ;;  %v1697_v32 = vadd.f32 %v2308_v53, %v4051_v25  ;;  %v1444_v63 = vpop.f32.mrf.mxu1 }
 0x278   :  { %v1445_v29 = vadd.f32 %v1444_v63, %v4077_v56  ;;  %v2310_v41 = vpop.f32.mrf.mxu0 }
 0x279   :  { %2736 = vtanh.f32 %v1697_v32  ;;  %v2311_v45 = vadd.f32 %v2310_v41, %v2309_v10  ;;  %v1446_v51 = vpop.f32.mrf.mxu1  ;;  %v4171_v10 = vpop.permute.xlu1 %1177 }
 0x27a   :  { %v1447_v58 = vadd.f32 %v1446_v51, %v4077_v56  ;;  %v2312_v19 = vpop.f32.mrf.mxu0  ;;  %2738 = vtanh.f32 %v1445_v29  ;;  %v4167_v53 = vpop.eup %2730 }
 0x27b   :  { %v1702_v21 = vadd.f32 %v2311_v45, %v4162_v33  ;;  %v1448_v62 = vpop.f32.mrf.mxu1  ;;  %4647 = vst [vmem:[#allocation13_spill] sm:$0xff] %v4167_v53 }
 0x27c   :  { %v1449_v3 = vadd.f32 %v1448_v62, %v4080_v2  ;;  %v2313_v20 = vpop.f32.mrf.mxu0  ;;  %2740 = vtanh.f32 %v1447_v58 }
 0x27d   :  { %v2314_v35 = vadd.f32 %v2313_v20, %v2312_v19  ;;  %v1450_v63 = vpop.f32.mrf.mxu1 }
 0x27e   :  { %v4169_v32 = vpop.eup %2732  ;;  %2742 = vtanh.f32 %v1449_v3  ;;  %v1451_v56 = vadd.f32 %v1450_v63, %v4080_v2  ;;  %v2315_v41 = vpop.f32.mrf.mxu0 }
 0x27f   :  { %4648 = vst [vmem:[#allocation14_spill] sm:$0xff] %v4169_v32  ;;  %2744 = vtanh.f32 %v1702_v21  ;;  %v1705_v45 = vadd.f32 %v2314_v35, %v4171_v10  ;;  %v1454_v29 = vpop.f32.mrf.mxu1 }
 0x280   :  { %2746 = vtanh.f32 %v1451_v56  ;;  %v1455_v58 = vadd.f32 %v1454_v29, %v4073_v0  ;;  %v2316_v19 = vpop.f32.mrf.mxu0 }
 0x281   :  { %2748 = vtanh.f32 %v1705_v45  ;;  %v2317_v62 = vadd.f32 %v2316_v19, %v2315_v41  ;;  %v1456_v20 = vpop.f32.mrf.mxu1 }
 0x282   :  { %v1457_v38 = vadd.f32 %v1456_v20, %v4073_v0  ;;  %v2318_v3 = vpop.f32.mrf.mxu0  ;;  %2750 = vtanh.f32 %v1455_v58  ;;  %v4181_v12 = vpop.eup %2734 }
 0x283   :  { %v1710_v2 = vadd.f32 %v2317_v62, %v4149_v5  ;;  %v1458_v63 = vpop.f32.mrf.mxu1  ;;  %4649 = vst [vmem:[#allocation10_spill] sm:$0xff] %v4181_v12 }
 0x284   :  { %v1459_v21 = vadd.f32 %v1458_v63, %v4075_v48  ;;  %v2319_v35 = vpop.f32.mrf.mxu0  ;;  %2752 = vtanh.f32 %v1457_v38 }
 0x285   :  { %v2320_v56 = vadd.f32 %v2319_v35, %v2318_v3  ;;  %v1460_v7 = vpop.f32.mrf.mxu1 }
 0x286   :  { %v4183_v29 = vpop.eup %2736  ;;  %2754 = vtanh.f32 %v1459_v21  ;;  %v1461_v41 = vadd.f32 %v1460_v7, %v4075_v48  ;;  %v2321_v45 = vpop.f32.mrf.mxu0 }
 0x287   :  { %4650 = vst [vmem:[#allocation25_spill] sm:$0xff] %v4183_v29  ;;  %2756 = vtanh.f32 %v1710_v2  ;;  %v1713_v0 = vadd.f32 %v2320_v56, %v4159_v11  ;;  %v4187_v19 = vpop.f32.mrf.mxu1  ;;  %v4191_v20 = vpop.eup %2738 }
 0x288   :  { %2758 = vtanh.f32 %v1461_v41  ;;  %v2322_v62 = vpop.f32.mrf.mxu0 }
 0x289   :  { %2760 = vtanh.f32 %v1713_v0  ;;  %v4193_v38 = vadd.f32 %v2322_v62, %v2321_v45  ;;  %v4195_v3 = vpop.f32.mrf.mxu1  ;;  %v4197_v63 = vpop.eup %2740 }
 0x28b   :  { %4651 = vst [vmem:[#allocation8_spill] sm:$0xff] %v4193_v38  ;;  %v4199_v48 = vpop.eup %2742  ;;  %v4201_v7 = vpop.f32.mrf.mxu1 }
 0x28c   :  { %v4203_v2 = vpop.eup %2744 }
 0x28d   :  { %4652 = vst [vmem:[#allocation19_spill] sm:$0xff] %v4203_v2  ;;  %v4207_v35 = vpop.eup %2746  ;;  %v1470_v56 = vpop.f32.mrf.mxu1 }
 0x28e   :  { %v4209_v41 = vpop.eup %2748 }
 0x28f   :  { %4653 = vst [vmem:[#allocation9_spill] sm:$0xff] %v4209_v41  ;;  %v4213_v0 = vpop.f32.mrf.mxu1  ;;  %v4217_v57 = vpop.eup %2750  ;;  %v1471_v41 = vadd.f32 %v1470_v56, %v4071_v28 }
 0x291   :  { %v1476_v47 = vpop.f32.mrf.mxu1  ;;  %v4219_v60 = vpop.eup %2752  ;;  %2762 = vtanh.f32 %v1471_v41 }
 0x293   :  { %v4221_v51 = vpop.eup %2754  ;;  %v1478_v58 = vpop.f32.mrf.mxu1 }
 0x294   :  { %v4223_v21 = vpop.eup %2756  ;;  %v1479_v26 = vadd.f32 %v1478_v58, %v4067_v54 }
 0x295   :  { %4654 = vst [vmem:[#allocation26_spill] sm:$0xff] %v4223_v21  ;;  %v4227_v43 = vpop.eup %2758  ;;  %v1480_v45 = vpop.f32.mrf.mxu1 }
 0x296   :  { %v4229_v61 = vpop.eup %2760  ;;  %v1481_v32 = vadd.f32 %v1480_v45, %v4067_v54 }
 0x297   :  { %4655 = vst [vmem:[#allocation11_spill] sm:$0xff] %v4229_v61  ;;  %v4233_v2 = vpop.f32.mrf.mxu1  ;;  %v1477_v61 = vadd.f32 %v1476_v47, %v4065_v50 }
 0x299   :  { %v4237_v36 = vpop.f32.mrf.mxu1  ;;  %2764 = vtanh.f32 %v1477_v61 }
 0x29a   :  { %2766 = vtanh.f32 %v1479_v26 }
 0x29b   :  { %v4239_v24 = vpop.f32.mrf.mxu1  ;;  %2768 = vtanh.f32 %v1481_v32 }
 0x29d   :  { %v1490_v34 = vpop.f32.mrf.mxu1 }
 0x29e   :  { %v1491_v12 = vadd.f32 %v1490_v34, %v4063_v4 }
 0x29f   :  { %v1494_v6 = vpop.f32.mrf.mxu1 }
 0x2a0   :  { %2770 = vtanh.f32 %v1491_v12 }
 0x2a1   :  { %v1496_v39 = vpop.f32.mrf.mxu1 }
 0x2a2   :  { %v1497_v38 = vadd.f32 %v1496_v39, %v4057_v1  ;;  %v4262_v39 = vpop.f32.mrf.mxu0 }
 0x2a3   :  { %v1498_v40 = vpop.f32.mrf.mxu1 }
 0x2a4   :  { %v1499_v56 = vadd.f32 %v1498_v40, %v4059_v16  ;;  %2772 = vtanh.f32 %v1497_v38 }
 0x2a5   :  { %v1500_v27 = vpop.f32.mrf.mxu1 }
 0x2a6   :  { %v1501_v8 = vadd.f32 %v1500_v27, %v4059_v16  ;;  %2774 = vtanh.f32 %v1499_v56 }
 0x2a7   :  { %v1504_v62 = vpop.f32.mrf.mxu1 }
 0x2a8   :  { %2776 = vtanh.f32 %v1501_v8  ;;  %v4269_v8 = vpop.f32.mrf.mxu0 }
 0x2a9   :  { %v1506_v21 = vpop.f32.mrf.mxu1 }
 0x2aa   :  { %v1507_v16 = vadd.f32 %v1506_v21, %v4053_v23  ;;  %v4282_v45 = vpop.f32.mrf.mxu0 }
 0x2ab   :  { %v1508_v53 = vpop.f32.mrf.mxu1 }
 0x2ac   :  { %v1509_v27 = vadd.f32 %v1508_v53, %v4055_v13 }
 0x2ad   :  { %v1510_v29 = vpop.f32.mrf.mxu1 }
 0x2ae   :  { %v1511_v47 = vadd.f32 %v1510_v29, %v4055_v13  ;;  %v1505_v29 = vadd.f32 %v1504_v62, %v4053_v23  ;;  %v1495_v62 = vadd.f32 %v1494_v6, %v4057_v1  ;;  %v1485_v1 = vadd.f32 %v4233_v2, %v4061_v22 }
 0x2af   :  { %v1514_v46 = vpop.f32.mrf.mxu1  ;;  %v1475_v2 = vadd.f32 %v4213_v0, %v4065_v50 }
 0x2b0   :  { %2778 = vtanh.f32 %v1511_v47  ;;  %v1515_v40 = vadd.f32 %v1514_v46, %v4049_v49 }
 0x2b1   :  { %v1516_v58 = vpop.f32.mrf.mxu1 }
 0x2b2   :  { %v1517_v54 = vadd.f32 %v1516_v58, %v4049_v49  ;;  %v4272_v49 = vpop.eup %2762  ;;  %v1487_v58 = vadd.f32 %v4237_v36, %v4061_v22 }
 0x2b3   :  { %v1518_v34 = vpop.f32.mrf.mxu1  ;;  %v4274_v46 = vpop.eup %2764 }
 0x2b4   :  { %v1519_v61 = vadd.f32 %v1518_v34, %v4051_v25  ;;  %2780 = vtanh.f32 %v1517_v54  ;;  %v4277_v53 = vpop.eup %2766  ;;  %v1489_v34 = vadd.f32 %v4239_v24, %v4063_v4 }
 0x2b5   :  { %v1520_v26 = vpop.f32.mrf.mxu1  ;;  %v4280_v21 = vpop.eup %2768 }
 0x2b6   :  { %v1521_v12 = vadd.f32 %v1520_v26, %v4051_v25  ;;  %2782 = vtanh.f32 %v1519_v61  ;;  %v4285_v47 = vpop.eup %2770  ;;  %v4296_v26 = vpop.f32.mrf.mxu0 }
 0x2b7   :  { %v1524_v32 = vpop.f32.mrf.mxu1  ;;  %v2773_v54 = vpop.eup %2772 }
 0x2b8   :  { %2784 = vtanh.f32 %v1521_v12  ;;  %v1525_v38 = vadd.f32 %v1524_v32, %v4162_v33 }
 0x2b9   :  { %2786 = vtanh.f32 %v1515_v40  ;;  %v1526_v41 = vpop.f32.mrf.mxu1  ;;  %v4292_v40 = vpop.eup %2774 }
 0x2ba   :  { %2788 = vtanh.f32 %v1507_v16  ;;  %v1527_v25 = vadd.f32 %v1526_v41, %v4162_v33  ;;  %v2777_v6 = vpop.eup %2776 }
 0x2bb   :  { %2790 = vtanh.f32 %v1509_v27  ;;  %v1528_v13 = vpop.f32.mrf.mxu1 }
 0x2bc   :  { %2792 = vtanh.f32 %v1505_v29  ;;  %v1529_v23 = vadd.f32 %v1528_v13, %v4171_v10  ;;  %v4303_v29 = vpop.f32.mrf.mxu0 }
 0x2bd   :  { %2794 = vtanh.f32 %v1525_v38  ;;  %v1530_v56 = vpop.f32.mrf.mxu1 }
 0x2be   :  { %2796 = vtanh.f32 %v1529_v23  ;;  %v1531_v33 = vadd.f32 %v1530_v56, %v4171_v10  ;;  %v2779_v10 = vpop.eup %2778 }
 0x2bf   :  { %2798 = vtanh.f32 %v1527_v25  ;;  %v1534_v61 = vpop.f32.mrf.mxu1  ;;  %v1467_v25 = vadd.f32 %v4195_v3, %v4069_v30  ;;  %v1465_v3 = vadd.f32 %v4187_v19, %v4069_v30  ;;  %v4662_v30 = vpack.c.bf16 %v4227_v43, %v4219_v60 }
 0x2c0   :  { %2800 = vtanh.f32 %v1531_v33  ;;  %v1535_v36 = vadd.f32 %v1534_v61, %v4149_v5  ;;  %v4665_v43 = vpack.c.bf16 %v4199_v48, %v4191_v20 }
 0x2c1   :  { %2802 = vtanh.f32 %v1495_v62  ;;  %v1536_v16 = vpop.f32.mrf.mxu1  ;;  %v2781_v12 = vpop.eup %2780  ;;  %v1469_v62 = vadd.f32 %v4201_v7, %v4071_v28 }
 0x2c2   :  { %2804 = vtanh.f32 %v1487_v58  ;;  %v1537_v4 = vadd.f32 %v1536_v16, %v4149_v5  ;;  %v1877_v16 = vpack.c.bf16 %v2777_v6, %v2773_v54 }
 0x2c3   :  { %2806 = vtanh.f32 %v1489_v34  ;;  %v1538_v24 = vpop.f32.mrf.mxu1  ;;  %v2783_v27 = vpop.eup %2782 }
 0x2c4   :  { %2808 = vtanh.f32 %v1485_v1  ;;  %v1539_v32 = vadd.f32 %v1538_v24, %v4159_v11  ;;  %v4314_v34 = vpop.f32.mrf.mxu0 }
 0x2c5   :  { %v2785_v22 = vpop.eup %2784  ;;  %2810 = vtanh.f32 %v1535_v36  ;;  %v1540_v38 = vpop.f32.mrf.mxu1 }
 0x2c6   :  { %v2787_v41 = vpop.eup %2786  ;;  %2812 = vtanh.f32 %v1539_v32  ;;  %v1541_v5 = vadd.f32 %v1540_v38, %v4159_v11  ;;  %v1883_v13 = vpack.c.bf16 %v2785_v22, %v2781_v12 }
 0x2c7   :  { %v2789_v23 = vpop.eup %2788  ;;  %2814 = vtanh.f32 %v1537_v4  ;;  %v4310_v56 = vpop.f32.mrf.mxu1  ;;  %v1882_v50 = vpack.c.bf16 %v2783_v27, %v2787_v41 }
 0x2c8   :  { %v2791_v0 = vpop.eup %2790  ;;  %2816 = vtanh.f32 %v1541_v5  ;;  %1922 = vmatprep.subr.bf16.mxu1 %v1883_v13  ;;  %v1880_v58 = vpack.c.bf16 %v2779_v10, %v2789_v23  ;;  %v4330_v10 = vpop.f32.mrf.mxu0 }
 0x2c9   :  { %v2793_v33 = vpop.eup %2792  ;;  %2818 = vtanh.f32 %v1475_v2  ;;  %v4316_v11 = vpop.f32.mrf.mxu1  ;;  %1923 = vmatpush1.bf16.msra.mxu1 %v1882_v50 }
 0x2ca   :  { %v4318_v61 = vpop.eup %2794  ;;  %2820 = vtanh.f32 %v1467_v25  ;;  %1924 = vmatprep.subr.bf16.mxu1 %v1880_v58  ;;  %v1879_v1 = vpack.c.bf16 %v2791_v0, %v2793_v33  ;;  %v4340_v38 = vpop.f32.mrf.mxu0 }
 0x2cb   :  { %4658 = vst [vmem:[#allocation31_spill] sm:$0xff] %v4318_v61  ;;  %v4320_v28 = vpop.eup %2796  ;;  %2822 = vtanh.f32 %v1469_v62  ;;  %v4322_v7 = vpop.f32.mrf.mxu1 }
 0x2cc   :  { %4659 = vst [vmem:[#allocation23_spill] sm:$0xff] %v4320_v28  ;;  %v4324_v36 = vpop.eup %2798  ;;  %2824 = vtanh.f32 %v1465_v3  ;;  %v4358_v0 = vpop.f32.mrf.mxu0 }
 0x2cd   :  { %4660 = vst [vmem:[#allocation33_spill] sm:$0xff] %v4324_v36  ;;  %v4328_v19 = vpop.eup %2800  ;;  %v4332_v12 = vpop.f32.mrf.mxu1  ;;  %1925 = vmatpush1.bf16.msra.mxu1 %v1879_v1 }
 0x2ce   :  { %4661 = vst [vmem:[#allocation34_spill] sm:$0xff] %v4328_v19  ;;  %v2803_v4 = vpop.eup %2802  ;;  %1926 = vmatprep.subr.bf16.mxu1 %v1877_v16 }
 0x2cf   :  { %v2805_v27 = vpop.eup %2804  ;;  %v4336_v32 = vpop.f32.mrf.mxu1  ;;  %v1876_v54 = vpack.c.bf16 %v4292_v40, %v2803_v4  ;;  %v1871_v40 = vpack.c.bf16 %v4280_v21, %v4274_v46 }
 0x2d0   :  { %v2807_v6 = vpop.eup %2806  ;;  %v1874_v22 = vpack.c.bf16 %v4285_v47, %v2805_v27  ;;  %v4368_v27 = vpop.f32.mrf.mxu0 }
 0x2d1   :  { %v2809_v2 = vpop.eup %2808  ;;  %v4342_v41 = vpop.f32.mrf.mxu1  ;;  %1927 = vmatpush1.bf16.msra.mxu1 %v1876_v54 }
 0x2d2   :  { %v4344_v25 = vpop.eup %2810  ;;  %1928 = vmatprep.subr.bf16.mxu1 %v1874_v22  ;;  %v1873_v23 = vpack.c.bf16 %v2807_v6, %v2809_v2 }
 0x2d3   :  { %v4346_v5 = vpop.eup %2812  ;;  %v4348_v13 = vpop.f32.mrf.mxu1 }
 0x2d4   :  { %v4350_v62 = vpop.eup %2814 }
 0x2d5   :  { %v4356_v50 = vpop.eup %2816  ;;  %v4360_v58 = vpop.f32.mrf.mxu1  ;;  %1929 = vmatpush1.bf16.msra.mxu1 %v1873_v23 }
 0x2d6   :  { %v2819_v33 = vpop.eup %2818  ;;  %1930 = vmatprep.subr.bf16.mxu1 %v1871_v40  ;;  %v4370_v23 = vpop.f32.mrf.mxu0 }
 0x2d7   :  { %v2821_v1 = vpop.eup %2820  ;;  %v4364_v16 = vpop.f32.mrf.mxu1  ;;  %v1870_v46 = vpack.c.bf16 %v4277_v53, %v2819_v33 }
 0x2d8   :  { %v2823_v21 = vpop.eup %2822  ;;  %v1868_v4 = vpack.c.bf16 %v4272_v49, %v2821_v1  ;;  %v4375_v33 = vpop.f32.mrf.mxu0  ;;  %v4663_v1 = vpack.c.bf16 %v4221_v51, %v4217_v57 }
 0x2d9   :  { %v1566_v54 = vpop.f32.mrf.mxu1  ;;  %1931 = vmatpush1.bf16.msra.mxu1 %v1870_v46  ;;  %v2825_v6 = vpop.eup %2824  ;;  %v4664_v46 = vpack.c.bf16 %v4207_v35, %v4197_v63 }
 0x2da   :  { %1932 = vmatprep.subr.bf16.mxu1 %v1868_v4  ;;  %v1867_v2 = vpack.c.bf16 %v2823_v21, %v2825_v6  ;;  %v4383_v4 = vpop.f32.mrf.mxu0 }
 0x2db   :  { %v1568_v22 = vpop.f32.mrf.mxu1 }
 0x2dd   :  { %v1570_v40 = vpop.f32.mrf.mxu1  ;;  %1933 = vmatpush1.bf16.msra.mxu1 %v1867_v2 }
 0x2de   :  { %1934 = vmatprep.subr.bf16.mxu1 %v4662_v30  ;;  %v4388_v30 = vpop.f32.mrf.mxu0 }
 0x2df   :  { %v1574_v53 = vpop.f32.mrf.mxu1 }
 0x2e0   :  { %v4390_v47 = vpop.f32.mrf.mxu0 }
 0x2e1   :  { %v1576_v49 = vpop.f32.mrf.mxu1  ;;  %1935 = vmatpush1.bf16.msra.mxu1 %v4663_v1 }
 0x2e2   :  { %1936 = vmatprep.subr.bf16.mxu1 %v4664_v46  ;;  %v4392_v1 = vpop.f32.mrf.mxu0 }
 0x2e3   :  { %v1578_v21 = vpop.f32.mrf.mxu1 }
 0x2e4   :  { %v4397_v48 = vpop.f32.mrf.mxu0 }
 0x2e5   :  { %v1580_v6 = vpop.f32.mrf.mxu1  ;;  %1937 = vmatpush1.bf16.msra.mxu1 %v4665_v43 }
 0x2e7   :  { %v1584_v60 = vpop.f32.mrf.mxu1 }
 0x2e9   :  { %v1586_v2 = vpop.f32.mrf.mxu1 }
 0x2ea   :  { %v1587_v28 = vadd.f32 %v1586_v2, %v4102_v52  ;;  %v1571_v2 = vadd.f32 %v1570_v40, %v4128_v44 }
 0x2eb   :  { %v1588_v24 = vpop.f32.mrf.mxu1 }
 0x2ec   :  { %v1589_v19 = vadd.f32 %v1588_v24, %v4107_v59  ;;  %v1575_v24 = vadd.f32 %v1574_v53, %v4109_v17  ;;  %v1557_v53 = vadd.f32 %v4342_v41, %v4133_v9  ;;  %v1547_v41 = vadd.f32 %v4316_v11, %v4142_v14 }
 0x2ed   :  { %v1590_v57 = vpop.f32.mrf.mxu1 }
 0x2ee   :  { %v1591_v63 = vadd.f32 %v1590_v57, %v4107_v59  ;;  %v1581_v57 = vadd.f32 %v1580_v6, %v4119_v37  ;;  %v1569_v6 = vadd.f32 %v1568_v22, %v4128_v44 }
 0x2ef   :  { %v1594_v51 = vpop.f32.mrf.mxu1 }
 0x2f0   :  { %2826 = vtanh.f32 %v1591_v63  ;;  %v1595_v43 = vadd.f32 %v1594_v51, %v4093_v18  ;;  %v1577_v63 = vadd.f32 %v1576_v49, %v4109_v17  ;;  %v1579_v51 = vadd.f32 %v1578_v21, %v4119_v37 }
 0x2f1   :  { %v1596_v35 = vpop.f32.mrf.mxu1  ;;  %v1561_v49 = vadd.f32 %v4360_v58, %v4135_v31  ;;  %v1551_v58 = vadd.f32 %v4332_v12, %v4147_v55 }
 0x2f2   :  { %v1597_v46 = vadd.f32 %v1596_v35, %v4093_v18  ;;  %v4404_v35 = vpop.f32.mrf.mxu0 }
 0x2f3   :  { %v1598_v3 = vpop.f32.mrf.mxu1 }
 0x2f4   :  { %v1599_v20 = vadd.f32 %v1598_v3, %v4095_v15  ;;  %2828 = vtanh.f32 %v1597_v46  ;;  %v1585_v3 = vadd.f32 %v1584_v60, %v4102_v52 }
 0x2f5   :  { %v1600_v61 = vpop.f32.mrf.mxu1 }
 0x2f6   :  { %v1601_v36 = vadd.f32 %v1600_v61, %v4095_v15  ;;  %2830 = vtanh.f32 %v1599_v20  ;;  %v2351_v61 = vpop.f32.mrf.mxu0 }
 0x2f8   :  { %2832 = vtanh.f32 %v1601_v36  ;;  %v1567_v36 = vadd.f32 %v1566_v54, %v4121_v42  ;;  %v1559_v54 = vadd.f32 %v4348_v13, %v4135_v31  ;;  %v1549_v13 = vadd.f32 %v4322_v7, %v4147_v55 }
 0x2f9   :  { %2834 = vtanh.f32 %v1595_v43 }
 0x2fa   :  { %2836 = vtanh.f32 %v1587_v28  ;;  %v2352_v28 = vpop.f32.mrf.mxu0 }
 0x2fb   :  { %2838 = vtanh.f32 %v1589_v19  ;;  %v1565_v19 = vadd.f32 %v4364_v16, %v4121_v42  ;;  %v1555_v16 = vadd.f32 %v4336_v32, %v4133_v9  ;;  %v1545_v32 = vadd.f32 %v4310_v56, %v4142_v14 }
 0x2fc   :  { %2840 = vtanh.f32 %v1581_v57  ;;  %v2354_v46 = vpop.f32.mrf.mxu0 }
 0x2fd   :  { %2842 = vtanh.f32 %v1585_v3  ;;  %v2827_v40 = vpop.eup %2826 }
 0x2fe   :  { %2844 = vtanh.f32 %v1577_v63 }
 0x2ff   :  { %2846 = vtanh.f32 %v1579_v51 }
 0x300   :  { %2848 = vtanh.f32 %v1571_v2  ;;  %v2355_v2 = vpop.f32.mrf.mxu0 }
 0x301   :  { %2850 = vtanh.f32 %v1575_v24  ;;  %v2829_v21 = vpop.eup %2828 }
 0x302   :  { %2852 = vtanh.f32 %v1567_v36 }
 0x303   :  { %2854 = vtanh.f32 %v1569_v6  ;;  %v2831_v22 = vpop.eup %2830  ;;  %v2356_v6 = vadd.f32 %v2355_v2, %v2354_v46  ;;  %v2347_v46 = vadd.f32 %v4392_v1, %v4390_v47 }
 0x304   :  { %2856 = vtanh.f32 %v1561_v49 }
 0x305   :  { %v2833_v60 = vpop.eup %2832  ;;  %2858 = vtanh.f32 %v1565_v19  ;;  %v1750_v47 = vadd.f32 %v2347_v46, %v4102_v52 }
 0x306   :  { %v2835_v20 = vpop.eup %2834  ;;  %2860 = vtanh.f32 %v1557_v53  ;;  %v1907_v43 = vpack.c.bf16 %v2833_v60, %v2829_v21  ;;  %v2353_v53 = vadd.f32 %v2352_v28, %v2351_v61 }
 0x307   :  { %v2837_v57 = vpop.eup %2836  ;;  %2862 = vtanh.f32 %v1559_v54  ;;  %v1906_v3 = vpack.c.bf16 %v2831_v22, %v2835_v20  ;;  %v2350_v22 = vadd.f32 %v4404_v35, %v4397_v48 }
 0x308   :  { %v2839_v12 = vpop.eup %2838  ;;  %2864 = vtanh.f32 %v1551_v58  ;;  %1938 = vmatprep.subr.bf16.mxu1 %v1907_v43  ;;  %v1904_v63 = vpack.c.bf16 %v2827_v40, %v2837_v57  ;;  %v1761_v58 = vadd.f32 %v2356_v6, %v4095_v15  ;;  %v2344_v57 = vadd.f32 %v4388_v30, %v4383_v4  ;;  %v4677_v6 = vld [vmem:[#allocation10_spill] sm:$0xff] }
 0x309   :  { %v2841_v51 = vpop.eup %2840  ;;  %2866 = vtanh.f32 %v1555_v16  ;;  %1939 = vmatpush2.bf16.msra.mxu1 %v1906_v3  ;;  %v1753_v48 = vadd.f32 %v2350_v22, %v4107_v59  ;;  %v2341_v3 = vadd.f32 %v4375_v33, %v4370_v23  ;;  %v2338_v4 = vadd.f32 %v4368_v27, %v4358_v0 }
 0x30a   :  { %v2843_v11 = vpop.eup %2842  ;;  %2868 = vtanh.f32 %v1547_v41  ;;  %1940 = vmatprep.subr.bf16.mxu1 %v1904_v63  ;;  %v1758_v41 = vadd.f32 %v2353_v53, %v4093_v18  ;;  %v1745_v59 = vadd.f32 %v2344_v57, %v4119_v37  ;;  %v2332_v33 = vadd.f32 %v4314_v34, %v4303_v29  ;;  %v4687_v57 = vld [vmem:[#allocation12_spill] sm:$0xff] }
 0x30b   :  { %v2845_v24 = vpop.eup %2844  ;;  %2870 = vtanh.f32 %v1549_v13  ;;  %v1903_v36 = vpack.c.bf16 %v2839_v12, %v2843_v11  ;;  %v1742_v23 = vadd.f32 %v2341_v3, %v4109_v17  ;;  %v1737_v2 = vadd.f32 %v2338_v4, %v4128_v44  ;;  %v4673_v11 = vld [vmem:[#allocation31_spill] sm:$0xff] }
 0x30c   :  { %v2847_v7 = vpop.eup %2846  ;;  %v1901_v49 = vpack.c.bf16 %v2841_v51, %v2845_v24  ;;  %2872 = vtanh.f32 %v1545_v32  ;;  %v2335_v51 = vadd.f32 %v4340_v38, %v4330_v10  ;;  %v2329_v37 = vadd.f32 %v4296_v26, %v4282_v45  ;;  %v4669_v26 = vld [vmem:[#allocation33_spill] sm:$0xff]  ;;  %v4672_v32 = vld [vmem:[#allocation23_spill] sm:$0xff] }
 0x30d   :  { %v2849_v19 = vpop.eup %2848  ;;  %1941 = vmatpush2.bf16.msra.mxu1 %v1903_v36  ;;  %2874 = vtanh.f32 %v1761_v58  ;;  %v4666_v10 = vpack.c.bf16 %v4356_v50, %v4350_v62  ;;  %v2326_v17 = vadd.f32 %v4269_v8, %v4262_v39  ;;  %v1729_v38 = vadd.f32 %v2332_v33, %v4135_v31  ;;  %v4671_v8 = vld [vmem:[#allocation28_spill] sm:$0xff]  ;;  %v4690_v3 = vld [vmem:[#allocation27_spill] sm:$0xff] }
 0x30e   :  { %v2851_v40 = vpop.eup %2850  ;;  %1942 = vmatprep.subr.bf16.mxu1 %v1901_v49  ;;  %2876 = vtanh.f32 %v1758_v41  ;;  %v1734_v0 = vadd.f32 %v2335_v51, %v4121_v42  ;;  %v4667_v44 = vpack.c.bf16 %v4346_v5, %v4344_v25  ;;  %v1726_v45 = vadd.f32 %v2329_v37, %v4133_v9  ;;  %v4668_v42 = vld [vmem:[#allocation34_spill] sm:$0xff]  ;;  %v4675_v9 = vld [vmem:[#allocation8_spill] sm:$0xff]  ;;  %v4695_v4 = vld [vmem:[#allocation11_spill] sm:$0xff] }
 0x30f   :  { %v2853_v21 = vpop.eup %2852  ;;  %v1900_v54 = vpack.c.bf16 %v2847_v7, %v2851_v40  ;;  %2878 = vtanh.f32 %v1753_v48  ;;  %v4670_v34 = vpack.c.bf16 %v4668_v42, %v4669_v26  ;;  %v1721_v50 = vadd.f32 %v2326_v17, %v4147_v55  ;;  %v4676_v7 = vld [vmem:[#allocation25_spill] sm:$0xff]  ;;  %v4699_v51 = vld [vmem:[#allocation32_spill] sm:$0xff]  ;;  %v4702_v33 = vld [vmem:[#allocation19_spill] sm:$0xff]  ;;  %v1913_v17 = vpop.permute.xlu0 %1912 }
 0x310   :  { %v2855_v56 = vpop.eup %2854  ;;  %v1898_v60 = vpack.c.bf16 %v2849_v19, %v2853_v21  ;;  %2880 = vtanh.f32 %v1750_v47  ;;  %v2171_v31 = vcombine.low %v4671_v8, %v4671_v8  ;;  %v4674_v25 = vpack.c.bf16 %v4672_v32, %v4673_v11  ;;  %v4679_v19 = vld [vmem:[#allocation17_spill] sm:$0xff]  ;;  %v4704_v37 = vld [vmem:[#allocation30_spill] sm:$0xff] }
 0x311   :  { %v2857_v16 = vpop.eup %2856  ;;  %1943 = vmatpush2.bf16.msra.mxu1 %v1900_v54  ;;  %2882 = vtanh.f32 %v1745_v59  ;;  %v1718_v5 = vadd.f32 %v4675_v9, %v4142_v14  ;;  %v4678_v49 = vpack.c.bf16 %v4676_v7, %v4677_v6  ;;  %v4680_v54 = vld [vmem:[#allocation14_spill] sm:$0xff]  ;;  %v4681_v14 = vld [vmem:[#allocation13_spill] sm:$0xff] }
 0x312   :  { %v2859_v20 = vpop.eup %2858  ;;  %1944 = vmatprep.subr.bf16.mxu1 %v1898_v60  ;;  %2884 = vtanh.f32 %v1742_v23  ;;  %v4696_v59 = vld [vmem:[#allocation26_spill] sm:$0xff] }
 0x313   :  { %v2861_v61 = vpop.eup %2860  ;;  %v1897_v28 = vpack.c.bf16 %v2855_v56, %v2859_v20  ;;  %2886 = vtanh.f32 %v1737_v2  ;;  %v4682_v56 = vpack.c.bf16 %v4680_v54, %v4681_v14  ;;  %v4684_v20 = vld [vmem:[#allocation18_spill] sm:$0xff] }
 0x314   :  { %v2863_v43 = vpop.eup %2862  ;;  %v1895_v15 = vpack.c.bf16 %v2857_v16, %v2861_v61  ;;  %2888 = vtanh.f32 %v1734_v0  ;;  %v4683_v16 = vld [vmem:[#allocation16_spill] sm:$0xff] }
 0x315   :  { %v2865_v35 = vpop.eup %2864  ;;  %1945 = vmatpush2.bf16.msra.mxu1 %v1897_v28  ;;  %2890 = vtanh.f32 %v1729_v38  ;;  %v4685_v46 = vpack.c.bf16 %v4683_v16, %v4684_v20  ;;  %v4705_v0 = vld [vmem:[#allocation20_spill] sm:$0xff] }
 0x316   :  { %v2867_v13 = vpop.eup %2866  ;;  %1946 = vmatprep.subr.bf16.mxu1 %v1895_v15  ;;  %2892 = vtanh.f32 %v1726_v45 }
 0x317   :  { %v2869_v18 = vpop.eup %2868  ;;  %v1894_v1 = vpack.c.bf16 %v2863_v43, %v2867_v13  ;;  %2894 = vtanh.f32 %v1721_v50  ;;  %v4686_v43 = vld [vmem:[#allocation22_spill] sm:$0xff]  ;;  %v4689_v13 = vld [vmem:[#allocation15_spill] sm:$0xff] }
 0x318   :  { %v2871_v12 = vpop.eup %2870  ;;  %v1892_v30 = vpack.c.bf16 %v2865_v35, %v2869_v18  ;;  %2896 = vtanh.f32 %v1718_v5  ;;  %v4688_v48 = vpack.c.bf16 %v4686_v43, %v4687_v57  ;;  %v4691_v47 = vpack.c.bf16 %v4689_v13, %v4690_v3  ;;  %v4692_v18 = vld [vmem:[#allocation21_spill] sm:$0xff] }
 0x319   :  { %1947 = vmatpush2.bf16.msra.mxu1 %v1894_v1  ;;  %v2873_v63 = vpop.eup %2872  ;;  %v4693_v1 = vld [vmem:[#allocation24_spill] sm:$0xff] }
 0x31a   :  { %1948 = vmatprep.subr.bf16.mxu1 %v1892_v30  ;;  %v1891_v52 = vpack.c.bf16 %v2871_v12, %v2873_v63  ;;  %v2875_v29 = vpop.eup %2874  ;;  %v4694_v12 = vpack.c.bf16 %v4692_v18, %v4693_v1  ;;  %v4697_v30 = vpack.c.bf16 %v4695_v4, %v4696_v59  ;;  %v4698_v63 = vld [vmem:[#allocation29_spill] sm:$0xff] }
 0x31b   :  { %v2877_v62 = vpop.eup %2876  ;;  %v4700_v23 = vpack.c.bf16 %v4698_v63, %v4699_v51 }
 0x31c   :  { %v1908_v39 = vpack.c.bf16 %v2875_v29, %v2877_v62  ;;  %v2879_v27 = vpop.eup %2878 }
 0x31d   :  { %1949 = vmatpush2.bf16.msra.mxu1 %v1891_v52  ;;  %v2881_v24 = vpop.eup %2880  ;;  %v4701_v52 = vld [vmem:[#allocation9_spill] sm:$0xff] }
 0x31e   :  { %1950 = vmatprep.subr.bf16.mxu1 %v4666_v10  ;;  %v1905_v36 = vpack.c.bf16 %v2879_v27, %v2881_v24  ;;  %v2883_v55 = vpop.eup %2882  ;;  %v4703_v2 = vpack.c.bf16 %v4701_v52, %v4702_v33  ;;  %v4706_v10 = vpack.c.bf16 %v4704_v37, %v4705_v0 }
 0x31f   :  { %v2885_v40 = vpop.eup %2884 }
 0x320   :  { %v1902_v53 = vpack.c.bf16 %v2883_v55, %v2885_v40  ;;  %v2887_v21 = vpop.eup %2886 }
 0x321   :  { %1951 = vmatpush2.bf16.msra.mxu1 %v4667_v44  ;;  %v2889_v22 = vpop.eup %2888 }
 0x322   :  { %1952 = vmatprep.subr.bf16.mxu1 %v4670_v34  ;;  %v1899_v58 = vpack.c.bf16 %v2887_v21, %v2889_v22  ;;  %v2891_v60 = vpop.eup %2890 }
 0x323   :  { %v2893_v41 = vpop.eup %2892 }
 0x324   :  { %v1896_v61 = vpack.c.bf16 %v2891_v60, %v2893_v41  ;;  %v2895_v28 = vpop.eup %2894 }
 0x325   :  { %1953 = vmatpush2.bf16.msra.mxu1 %v4674_v25  ;;  %v2897_v15 = vpop.eup %2896 }
 0x326   :  { %2357 = vmatprep.subr.bf16.mxu1 %v1908_v39  ;;  %v1893_v35 = vpack.c.bf16 %v2895_v28, %v2897_v15 }
 0x328   :  { %1955 = vmatmul.mubr.bf16.vlgmr.msra.gmra.mxu1 %v2171_v31 }
 0x329   :  { %2358 = vmatpush3.bf16.msra.mxu1 %v4678_v49  ;;  %1995 = vmatprep.mubr.bf16.mxu1 %v4679_v19 }
 0x32a   :  { %2359 = vmatprep.subr.bf16.mxu1 %v1905_v36 }
 0x32d   :  { %2360 = vmatpush3.bf16.msra.mxu1 %v4682_v56 }
 0x32e   :  { %2361 = vmatprep.subr.bf16.mxu1 %v1902_v53 }
 0x331   :  { %2362 = vmatpush3.bf16.msra.mxu1 %v4685_v46 }
 0x332   :  { %2363 = vmatprep.subr.bf16.mxu1 %v1899_v58 }
 0x335   :  { %2364 = vmatpush3.bf16.msra.mxu1 %v4688_v48 }
 0x336   :  { %2365 = vmatprep.subr.bf16.mxu1 %v1896_v61 }
 0x339   :  { %2366 = vmatpush3.bf16.msra.mxu1 %v4691_v47 }
 0x33a   :  { %2367 = vmatprep.subr.bf16.mxu1 %v1893_v35 }
 0x33d   :  { %2368 = vmatpush3.bf16.msra.mxu1 %v4694_v12 }
 0x33e   :  { %2369 = vmatprep.subr.bf16.mxu1 %v4697_v30 }
 0x341   :  { %2370 = vmatpush3.bf16.msra.mxu1 %v4700_v23 }
 0x342   :  { %2371 = vmatprep.subr.bf16.mxu1 %v4703_v2 }
 0x345   :  { %2372 = vmatpush3.bf16.msra.mxu1 %v4706_v10 }
 0x348   :  { %1996 = vmatmul.mubr.bf16.vlgmr.msra.gmra.mxu1 %v2171_v31 }
 0x3e8   :  { %v1956_v38 = vpop.f32.mrf.mxu1 }
 0x3e9   :  { %v1957_v29 = vadd.f32 %v1956_v38, %v1913_v17 }
 0x3ea   :  { %v1958_v44 = vpop.f32.mrf.mxu1 }
 0x3eb   :  { %v2006_v45 = vrot.slane %v1957_v29, 4  ;;  %2003 = vst [vmem:[#allocation2] sm:$0xff] %v1957_v29  ;;  %v1959_v42 = vadd.f32 %v1958_v44, %v1913_v17 }
 0x3ec   :  { %v1960_v26 = vpop.f32.mrf.mxu1 }
 0x3ed   :  { %v2007_v34 = vmax.f32 %v1957_v29, %v2006_v45  ;;  %v2012_v62 = vrot.slane %v1959_v42, 4  ;;  %2004 = vst [vmem:[#allocation2 + $0x8] sm:$0xff] %v1959_v42 }
 0x3ee   :  { %v1961_v50 = vpop.f32.mrf.mxu1 }
 0x3ef   :  { %v2008_v39 = vrot.slane %v2007_v34, 2  ;;  %v2013_v8 = vmax.f32 %v1959_v42, %v2012_v62 }
 0x3f1   :  { %v2009_v27 = vmax.f32 %v2007_v34, %v2008_v39  ;;  %v2014_v32 = vrot.slane %v2013_v8, 2 }
 0x3f3   :  { %v2015_v11 = vmax.f32 %v2013_v8, %v2014_v32  ;;  %v2010_v25 = vrot.slane %v2009_v27, 1 }
 0x3f5   :  { %v2011_v9 = vmax.f32 %v2009_v27, %v2010_v25  ;;  %v2016_v31 = vrot.slane %v2015_v11, 1 }
 0x3f7   :  { %v2017_v5 = vmax.f32 %v2015_v11, %v2016_v31  ;;  %v2024_v24 = vsub.f32 %v1957_v29, %v2011_v9 }
 0x3f9   :  { %v2025_v36 = vsub.f32 %v1959_v42, %v2017_v5  ;;  %v2027_v55 = vmul.f32 1.442695, %v2024_v24 }
 0x3fb   :  { %2898 = vpow2.f32 %v2027_v55  ;;  %v2029_v7 = vmul.f32 1.442695, %v2025_v36 }
 0x3fd   :  { %2900 = vpow2.f32 %v2029_v7 }
 0x408   :  { %v2899_v6 = vpop.eup %2898  ;;  %v2373_v49 = vpop.f32.mrf.mxu1 }
 0x409   :  { %v2033_v19 = vrot.slane %v2899_v6, 4 }
 0x40a   :  { %v2901_v40 = vpop.eup %2900  ;;  %v2374_v53 = vpop.f32.mrf.mxu1 }
 0x40b   :  { %v2375_v21 = vadd.f32 %v2374_v53, %v2373_v49  ;;  %v2034_v54 = vadd.f32 %v2899_v6, %v2033_v19  ;;  %v2039_v14 = vrot.slane %v2901_v40, 4 }
 0x40c   :  { %v2376_v56 = vpop.f32.mrf.mxu1 }
 0x40d   :  { %v1998_v22 = vadd.f32 %v2375_v21, %v1913_v17  ;;  %v2035_v58 = vrot.slane %v2034_v54, 2  ;;  %v2040_v60 = vadd.f32 %v2901_v40, %v2039_v14 }
 0x40e   :  { %v2377_v16 = vpop.f32.mrf.mxu1 }
 0x40f   :  { %v2018_v20 = vrot.slane %v1998_v22, 4  ;;  %2005 = vst [vmem:[#allocation2 + $0x10] sm:$0xff] %v1998_v22  ;;  %v2036_v46 = vadd.f32 %v2035_v58, %v2034_v54  ;;  %v2041_v41 = vrot.slane %v2040_v60, 2 }
 0x410   :  { %2921 = shalt.err (!%p2918_p4)
}
 0x411   :  { %2072 = dma.vmem_to_hbm [thread:$0]  %s2070_s18, 384, %s4520_s7, [#allocation3]   ;;  %v2019_v61 = vmax.f32 %v1998_v22, %v2018_v20  ;;  %v2037_v28 = vrot.slane %v2036_v46, 1  ;;  %v2042_v43 = vadd.f32 %v2041_v41, %v2040_v60 }
 0x412   :  { %s2956_s7 = smov [#allocation4]  }
 0x413   :  { %v2020_v57 = vrot.slane %v2019_v61, 2  ;;  %v2038_v48 = vadd.f32 %v2037_v28, %v2036_v46  ;;  %v2043_v15 = vrot.slane %v2042_v43, 1  ;;  %s2079_s22 = sshll.u32 %s2956_s7, 4  ;;  %s2080_s22 = int_to_ptr.vmem [resolvable:$true] %s2079_s22 }
 0x414   :  { %s2930_s23 = scalar_lea.vmem %s2080_s22, 384  ;;  %p2935_p6 = scmp.lt.s32.totalorder %s2080_s22, %s2080_s22 }
 0x415   :  { %v2021_v35 = vmax.f32 %v2019_v61, %v2020_v57  ;;  %v2044_v13 = vadd.f32 %v2043_v15, %v2042_v43  ;;  %2902 = vlog2.f32 %v2038_v48  ;;  %p2931_p5 = scmp.ne.s32.totalorder %s2080_s22, %s2930_s23  ;;  %p2936_p7 = scmp.lt.s32.totalorder %s2930_s23, %s2930_s23 }
 0x417   :  { %v2022_v3 = vrot.slane %v2021_v35, 1  ;;  %2904 = vlog2.f32 %v2044_v13  ;;  %p2937_p8 = por %p2936_p7, %p2935_p6 }
 0x419   :  { %v2023_v47 = vmax.f32 %v2021_v35, %v2022_v3  ;;  %p2938_p9 = pnand %p2937_p8, %p2931_p5 }
 0x41b   :  { %v2026_v18 = vsub.f32 %v1998_v22, %v2023_v47 }
 0x41d   :  { %v2031_v1 = vmul.f32 1.442695, %v2026_v18 }
 0x41f   :  { %2906 = vpow2.f32 %v2031_v1 }
 0x422   :  { %v2903_v12 = vpop.eup %2902 }
 0x423   :  { %v2052_v4 = vmul.f32 0.6931472, %v2903_v12 }
 0x424   :  { %v2905_v59 = vpop.eup %2904 }
 0x425   :  { %v2054_v30 = vmul.f32 0.6931472, %v2905_v59  ;;  %v2057_v63 = vsub.f32 %v2024_v24, %v2052_v4 }
 0x427   :  { %v2058_v51 = vsub.f32 %v2025_v36, %v2054_v30  ;;  %2060 = vst [vmem:[#allocation4] sm:$0xff] %v2057_v63 }
 0x429   :  { %2061 = vst [vmem:[#allocation4 + $0x8] sm:$0xff] %v2058_v51 }
 0x42c   :  { %v2907_v23 = vpop.eup %2906 }
 0x42d   :  { %v2045_v52 = vrot.slane %v2907_v23, 4 }
 0x42f   :  { %v2046_v33 = vadd.f32 %v2907_v23, %v2045_v52 }
 0x431   :  { %v2047_v2 = vrot.slane %v2046_v33, 2 }
 0x433   :  { %v2048_v37 = vadd.f32 %v2047_v2, %v2046_v33 }
 0x435   :  { %v2049_v0 = vrot.slane %v2048_v37, 1 }
 0x437   :  { %v2050_v10 = vadd.f32 %v2049_v0, %v2048_v37 }
 0x439   :  { %2908 = vlog2.f32 %v2050_v10 }
 0x446   :  { %v2909_v17 = vpop.eup %2908 }
 0x447   :  { %v2056_v38 = vmul.f32 0.6931472, %v2909_v17 }
 0x449   :  { %v2059_v29 = vsub.f32 %v2026_v18, %v2056_v38 }
 0x44b   :  { %2062 = vst [vmem:[#allocation4 + $0x10] sm:$0xff] %v2059_v29 }
 0x44c   :  { %2941 = shalt.err (!%p2938_p9)
}
 0x44d   :  { %2082 = dma.vmem_to_hbm [thread:$0]  %s2080_s22, 384, %s4521_s8, [#allocation5]  }
 0x44e   :  { %2950 = dma.done.wait [#allocation3], 384  }
 0x44f   :  { %2951 = vsyncadd [#allocation3], 4294966912 }
 0x450   :  { %2952 = dma.done.wait [#allocation5], 384  }
 0x451   :  { %2953 = vsyncadd [#allocation5], 4294966912 }
 0x452   :  { %2089 = vsyncpa [#allocation3], 1 }
 0x453   :  { %2090 = vsyncpa [#allocation5], 1 }

</bundles_post_ra>
